<compile_context>
chip_gen: v7x
topology: tpu7x:2x2x1
jax: 0.10.0
libtpu: 0.0.40
codegen_flags: <defaults>
</compile_context>

<pallas_src>
import functools
import math

import jax
import jax.numpy as jnp
from jax.experimental import pallas as pl
from jax.experimental.pallas import tpu as pltpu


def _layer_norm(x, gamma, beta, eps=1e-5):
    mu = jnp.mean(x, axis=-1, keepdims=True)
    var = jnp.mean(jnp.square(x - mu), axis=-1, keepdims=True)
    return (x - mu) * jax.lax.rsqrt(var + eps) * gamma + beta


def decoder_kernel(x_ref, pe_ref, wmats_ref, wf_ref, vecs_ref, out_ref,
                   *, n_head, n_layers, matmul_dtype):
    B, S, D = x_ref.shape
    Hd = D // n_head
    N = B * S
    scale = 1.0 / math.sqrt(Hd)
    mdt = matmul_dtype

    def mm(a, b):                       # 2-D MXU matmul, f32 accumulate
        return jnp.dot(a.astype(mdt), b.astype(mdt),
                       preferred_element_type=jnp.float32)

    def bmm(spec, a, b):                # head-batched MXU einsum, f32 accumulate
        return jnp.einsum(spec, a.astype(mdt), b.astype(mdt),
                          preferred_element_type=jnp.float32)

    def to_heads(t):
        # (N, D) -> (n_head*B, S, Hd); 8-aligned lane slices + major-axis concat
        # (D=32 makes lane-splitting reshapes risky; these ops are proven to lower).
        return jnp.concatenate(
            [t[:, h * Hd:(h + 1) * Hd].reshape(B, S, Hd) for h in range(n_head)],
            axis=0)

    vecs = vecs_ref[...]                # (10*L + 1, D) packed small vectors

    def vec(r):                         # row r as a (1, D) broadcastable bias / gain
        return vecs[r:r + 1, :]

    # Positional encoding added once; the running activation x2 stays (N, D).
    x2 = (x_ref[...].astype(jnp.float32) + pe_ref[...][None, :, :]).reshape(N, D)

    for l in range(n_layers):           # static, fully unrolled; all weights resident
        w = wmats_ref[l]                # (D, 6D) = [Wqkv | Wo | W1 | W2]
        r0 = 10 * l

        # ---- fused QKV projection: one MXU pass instead of three ----
        qkv = mm(x2, w[:, 0:3 * D])
        q = (qkv[:, 0 * D:1 * D] + vec(r0 + 0)) * scale   # fold 1/sqrt(Hd) into Q
        k = qkv[:, 1 * D:2 * D] + vec(r0 + 1)
        v = qkv[:, 2 * D:3 * D] + vec(r0 + 2)

        qh, kh, vh = to_heads(q), to_heads(k), to_heads(v)   # (H*B, S, Hd)

        # ---- head-batched attention: 2 batched einsums + ONE softmax ----
        s = bmm('gqd,gkd->gqk', qh, kh)                      # (H*B, S, S)
        s = s - jnp.max(s, axis=-1, keepdims=True)
        p = jnp.exp(s)
        p = p / jnp.sum(p, axis=-1, keepdims=True)           # exact divide (tiny tensor)
        a = bmm('gqk,gkd->gqd', p, vh)                       # (H*B, S, Hd)

        # merge heads back to (N, D) and apply output projection
        attn = jnp.concatenate(
            [a[h * B:(h + 1) * B].reshape(N, Hd) for h in range(n_head)], axis=-1)
        attn = mm(attn, w[:, 3 * D:4 * D]) + vec(r0 + 3)

        # ---- add & norm 1 ----
        x2 = _layer_norm(x2 + attn, vec(r0 + 4), vec(r0 + 5))

        # ---- position-wise FFN ----
        h1 = jnp.maximum(mm(x2, w[:, 4 * D:5 * D]) + vec(r0 + 6), 0.0)
        ff = mm(h1, w[:, 5 * D:6 * D]) + vec(r0 + 7)

        # ---- add & norm 2 ----
        x2 = _layer_norm(x2 + ff, vec(r0 + 8), vec(r0 + 9))

    # ---- final Linear(d_model, d_model) ----
    y = mm(x2, wf_ref[...]) + vec(10 * n_layers)

    # ---- lane-dense store: (N, D) -> (B, S*D) = 256 lanes (multiple of 128) ----
    y3 = y.reshape(B, S, D)
    dense = jnp.concatenate([y3[:, s] for s in range(S)], axis=-1)
    out_ref[...] = dense.astype(out_ref.dtype)


def sinusoidal_pos_encoding(max_len, d_model):
    pos = jnp.arange(max_len, dtype=jnp.float32)[:, None]
    i = jnp.arange(0, d_model, 2, dtype=jnp.float32)[None, :]
    angle = pos / jnp.power(10000.0, i / d_model)
    pe = jnp.zeros((max_len, d_model), jnp.float32)
    pe = pe.at[:, 0::2].set(jnp.sin(angle))
    pe = pe.at[:, 1::2].set(jnp.cos(angle))
    return pe


def init_params(key, n_layers, d_model, ffn_hidden):
    names = ['wqkv', 'bqkv', 'wo', 'bo', 'w1', 'b1', 'w2', 'b2', 'wf', 'bf']
    ks = dict(zip(names, jax.random.split(key, len(names))))

    def w(k, shape, scale=0.1):
        return scale * jax.random.normal(k, shape, jnp.float32)

    D, F, L = d_model, ffn_hidden, n_layers
    return {
        'wqkv': w(ks['wqkv'], (L, D, 3 * D)), 'bqkv': w(ks['bqkv'], (L, 1, 3 * D)),
        'wo': w(ks['wo'], (L, D, D)), 'bo': w(ks['bo'], (L, 1, D)),
        'g1': jnp.ones((L, 1, D), jnp.float32), 'be1': jnp.zeros((L, 1, D), jnp.float32),
        'w1': w(ks['w1'], (L, D, F)), 'b1': w(ks['b1'], (L, 1, F)),
        'w2': w(ks['w2'], (L, F, D)), 'b2': w(ks['b2'], (L, 1, D)),
        'g2': jnp.ones((L, 1, D), jnp.float32), 'be2': jnp.zeros((L, 1, D), jnp.float32),
        'wf': w(ks['wf'], (D, D)), 'bf': w(ks['bf'], (1, D)),
    }


def pack_params(params):
    """Pack the 14 parameter tensors into 3 arrays (cuts prologue DMA count)."""
    L, D, _ = params['wqkv'].shape
    F = params['w1'].shape[-1]
    assert F == D, "module spec sets ffn_hidden = d_model"
    # (L, D, 6D) = [Wqkv | Wo | W1 | W2] concatenated along lanes.
    wmats = jnp.concatenate(
        [params['wqkv'], params['wo'], params['w1'], params['w2']], axis=-1)
    rows = []
    for l in range(L):
        bqkv = params['bqkv'][l]                       # (1, 3D)
        rows += [bqkv[:, 0:D], bqkv[:, D:2 * D], bqkv[:, 2 * D:3 * D],
                 params['bo'][l],
                 params['g1'][l], params['be1'][l],
                 params['b1'][l], params['b2'][l],
                 params['g2'][l], params['be2'][l]]
    rows.append(params['bf'])
    vecs = jnp.concatenate(rows, axis=0)               # (10*L + 1, D)
    return wmats, params['wf'], vecs


def decoder_forward(x, pe, params, n_head, matmul_dtype=jnp.float32):
    B, S, D = x.shape
    L = params['wqkv'].shape[0]
    wmats, wf, vecs = pack_params(params)

    kernel = functools.partial(decoder_kernel, n_head=n_head, n_layers=L,
                               matmul_dtype=matmul_dtype)
    # Single program, no grid: every operand lives whole in VMEM (~70 KiB total here),
    # so there is exactly one prologue and one output write-back.
    out = pl.pallas_call(
        kernel,
        out_shape=jax.ShapeDtypeStruct((B, S * D), x.dtype),
        compiler_params=pltpu.CompilerParams(vmem_limit_bytes=32 * 1024 * 1024),
    )(x, pe, wmats, wf, vecs)
    # (B, S*D) and (B, S, D) share the same HBM layout -> this reshape is free.
    return out.reshape(B, S, D)


def decoder_ref(x, pe, params, n_head):
    """Pure-JAX reference mirroring the PyTorch forward."""
    B, S, D = x.shape
    L = params['wqkv'].shape[0]
    Hd = D // n_head
    h = x.astype(jnp.float32) + pe[None]
    for l in range(L):
        x2 = h.reshape(B * S, D)
        qkv = x2 @ params['wqkv'][l] + params['bqkv'][l]
        q = qkv[:, 0 * D:1 * D].reshape(B, S, n_head, Hd)
        k = qkv[:, 1 * D:2 * D].reshape(B, S, n_head, Hd)
        v = qkv[:, 2 * D:3 * D].reshape(B, S, n_head, Hd)
        s = jnp.einsum('bqhd,bkhd->bhqk', q, k) / math.sqrt(Hd)
        p = jax.nn.softmax(s, axis=-1)
        a = jnp.einsum('bhqk,bkhd->bqhd', p, v).reshape(B * S, D)
        a = a @ params['wo'][l] + params['bo'][l]
        x2 = _layer_norm(x2 + a, params['g1'][l], params['be1'][l])
        f = jnp.maximum(x2 @ params['w1'][l] + params['b1'][l], 0.0)
        f = f @ params['w2'][l] + params['b2'][l]
        x2 = _layer_norm(x2 + f, params['g2'][l], params['be2'][l])
        h = x2.reshape(B, S, D)
    out = h.reshape(B * S, D) @ params['wf'] + params['bf']
    return out.reshape(B, S, D)


if __name__ == "__main__":
    # configs: n_layers=2, d_model=32, num_heads=4, ffn_hidden=d_model,
    #          max_pos_len=64, drop_rate=0 (eval)
    B, S, D, H, L = 2, 8, 32, 4, 2
    MAX_POS = 64

    key = jax.random.PRNGKey(0)
    kx, kp = jax.random.split(key)
    trg = jax.random.normal(kx, (B, S, D), jnp.float32)
    params = init_params(kp, L, D, D)
    pe = sinusoidal_pos_encoding(MAX_POS, D)[:S]

    out = jax.block_until_ready(decoder_forward(trg, pe, params, H))
    ref = decoder_ref(trg, pe, params, H)

    assert out.shape == (B, S, D)
    err = float(jnp.max(jnp.abs(out - ref)))
    assert err < 2e-3, f"max abs err = {err}"
    print("KERNEL_OK")
</pallas_src>

<mosaic_0001>
module attributes {stable_mosaic.version = 11 : i64} {
  func.func @decoder_kernel(%arg0: memref<2x8x32xf32, #tpu.memory_space<vmem>>, %arg1: memref<8x32xf32, #tpu.memory_space<vmem>>, %arg2: memref<2x32x192xf32, #tpu.memory_space<vmem>>, %arg3: memref<32x32xf32, #tpu.memory_space<vmem>>, %arg4: memref<21x32xf32, #tpu.memory_space<vmem>>, %arg5: memref<2x256xf32, #tpu.memory_space<vmem>>) attributes {dimension_semantics = [], scalar_prefetch = 0 : i64, scratch_operands = 0 : i64, tpu.core_type = #tpu.core_type<tc>} {
    %c0 = arith.constant 0 : index
    %c0_0 = arith.constant 0 : index
    %0 = vector.load %arg4[%c0, %c0_0] : memref<21x32xf32, #tpu.memory_space<vmem>>, vector<21x32xf32>
    %c0_1 = arith.constant 0 : index
    %c0_2 = arith.constant 0 : index
    %c0_3 = arith.constant 0 : index
    %1 = vector.load %arg0[%c0_1, %c0_2, %c0_3] : memref<2x8x32xf32, #tpu.memory_space<vmem>>, vector<2x8x32xf32>
    %c0_4 = arith.constant 0 : index
    %c0_5 = arith.constant 0 : index
    %2 = vector.load %arg1[%c0_4, %c0_5] : memref<8x32xf32, #tpu.memory_space<vmem>>, vector<8x32xf32>
    %3 = vector.shape_cast %2 : vector<8x32xf32> to vector<1x8x32xf32>
    %4 = vector.broadcast %3 : vector<1x8x32xf32> to vector<2x8x32xf32>
    %5 = arith.addf %1, %4 : vector<2x8x32xf32>
    %6 = vector.shape_cast %5 : vector<2x8x32xf32> to vector<16x32xf32>
    %c0_6 = arith.constant 0 : index
    %c0_7 = arith.constant 0 : index
    %c0_8 = arith.constant 0 : index
    %7 = vector.load %arg2[%c0_6, %c0_7, %c0_8] : memref<2x32x192xf32, #tpu.memory_space<vmem>>, vector<1x32x192xf32>
    %8 = vector.shape_cast %7 : vector<1x32x192xf32> to vector<32x192xf32>
    %9 = vector.extract_strided_slice %8 {offsets = [0, 0], sizes = [32, 96], strides = [1, 1]} : vector<32x192xf32> to vector<32x96xf32>
    %cst = arith.constant dense<0.000000e+00> : vector<16x96xf32>
    %10 = tpu.matmul %6, %9, %cst {dimension_numbers = #tpu.dot_dimension_numbers<[1], [0], [0], [1], [0, 0, 1, 1], [], []>} : vector<16x32xf32>, vector<32x96xf32>, vector<16x96xf32> -> vector<16x96xf32>
    %11 = vector.extract_strided_slice %10 {offsets = [0, 0], sizes = [16, 32], strides = [1, 1]} : vector<16x96xf32> to vector<16x32xf32>
    %12 = vector.extract_strided_slice %0 {offsets = [0, 0], sizes = [1, 32], strides = [1, 1]} : vector<21x32xf32> to vector<1x32xf32>
    %13 = vector.broadcast %12 : vector<1x32xf32> to vector<16x32xf32>
    %14 = arith.addf %11, %13 : vector<16x32xf32>
    %cst_9 = arith.constant 0.353553385 : f32
    %15 = vector.broadcast %cst_9 : f32 to vector<16x32xf32>
    %16 = arith.mulf %14, %15 : vector<16x32xf32>
    %17 = vector.extract_strided_slice %10 {offsets = [0, 32], sizes = [16, 32], strides = [1, 1]} : vector<16x96xf32> to vector<16x32xf32>
    %18 = vector.extract_strided_slice %0 {offsets = [1, 0], sizes = [1, 32], strides = [1, 1]} : vector<21x32xf32> to vector<1x32xf32>
    %19 = vector.broadcast %18 : vector<1x32xf32> to vector<16x32xf32>
    %20 = arith.addf %17, %19 : vector<16x32xf32>
    %21 = vector.extract_strided_slice %10 {offsets = [0, 64], sizes = [16, 32], strides = [1, 1]} : vector<16x96xf32> to vector<16x32xf32>
    %22 = vector.extract_strided_slice %0 {offsets = [2, 0], sizes = [1, 32], strides = [1, 1]} : vector<21x32xf32> to vector<1x32xf32>
    %23 = vector.broadcast %22 : vector<1x32xf32> to vector<16x32xf32>
    %24 = arith.addf %21, %23 : vector<16x32xf32>
    %25 = vector.extract_strided_slice %16 {offsets = [0, 0], sizes = [16, 8], strides = [1, 1]} : vector<16x32xf32> to vector<16x8xf32>
    %26 = vector.shape_cast %25 : vector<16x8xf32> to vector<2x8x8xf32>
    %27 = vector.extract_strided_slice %16 {offsets = [0, 8], sizes = [16, 8], strides = [1, 1]} : vector<16x32xf32> to vector<16x8xf32>
    %28 = vector.shape_cast %27 : vector<16x8xf32> to vector<2x8x8xf32>
    %29 = vector.extract_strided_slice %16 {offsets = [0, 16], sizes = [16, 8], strides = [1, 1]} : vector<16x32xf32> to vector<16x8xf32>
    %30 = vector.shape_cast %29 : vector<16x8xf32> to vector<2x8x8xf32>
    %31 = vector.extract_strided_slice %16 {offsets = [0, 24], sizes = [16, 8], strides = [1, 1]} : vector<16x32xf32> to vector<16x8xf32>
    %32 = vector.shape_cast %31 : vector<16x8xf32> to vector<2x8x8xf32>
    %33 = tpu.concatenate %26, %28, %30, %32 in 0 : vector<2x8x8xf32>, vector<2x8x8xf32>, vector<2x8x8xf32>, vector<2x8x8xf32> -> vector<8x8x8xf32>
    %34 = vector.extract_strided_slice %20 {offsets = [0, 0], sizes = [16, 8], strides = [1, 1]} : vector<16x32xf32> to vector<16x8xf32>
    %35 = vector.shape_cast %34 : vector<16x8xf32> to vector<2x8x8xf32>
    %36 = vector.extract_strided_slice %20 {offsets = [0, 8], sizes = [16, 8], strides = [1, 1]} : vector<16x32xf32> to vector<16x8xf32>
    %37 = vector.shape_cast %36 : vector<16x8xf32> to vector<2x8x8xf32>
    %38 = vector.extract_strided_slice %20 {offsets = [0, 16], sizes = [16, 8], strides = [1, 1]} : vector<16x32xf32> to vector<16x8xf32>
    %39 = vector.shape_cast %38 : vector<16x8xf32> to vector<2x8x8xf32>
    %40 = vector.extract_strided_slice %20 {offsets = [0, 24], sizes = [16, 8], strides = [1, 1]} : vector<16x32xf32> to vector<16x8xf32>
    %41 = vector.shape_cast %40 : vector<16x8xf32> to vector<2x8x8xf32>
    %42 = tpu.concatenate %35, %37, %39, %41 in 0 : vector<2x8x8xf32>, vector<2x8x8xf32>, vector<2x8x8xf32>, vector<2x8x8xf32> -> vector<8x8x8xf32>
    %43 = vector.extract_strided_slice %24 {offsets = [0, 0], sizes = [16, 8], strides = [1, 1]} : vector<16x32xf32> to vector<16x8xf32>
    %44 = vector.shape_cast %43 : vector<16x8xf32> to vector<2x8x8xf32>
    %45 = vector.extract_strided_slice %24 {offsets = [0, 8], sizes = [16, 8], strides = [1, 1]} : vector<16x32xf32> to vector<16x8xf32>
    %46 = vector.shape_cast %45 : vector<16x8xf32> to vector<2x8x8xf32>
    %47 = vector.extract_strided_slice %24 {offsets = [0, 16], sizes = [16, 8], strides = [1, 1]} : vector<16x32xf32> to vector<16x8xf32>
    %48 = vector.shape_cast %47 : vector<16x8xf32> to vector<2x8x8xf32>
    %49 = vector.extract_strided_slice %24 {offsets = [0, 24], sizes = [16, 8], strides = [1, 1]} : vector<16x32xf32> to vector<16x8xf32>
    %50 = vector.shape_cast %49 : vector<16x8xf32> to vector<2x8x8xf32>
    %51 = tpu.concatenate %44, %46, %48, %50 in 0 : vector<2x8x8xf32>, vector<2x8x8xf32>, vector<2x8x8xf32>, vector<2x8x8xf32> -> vector<8x8x8xf32>
    "tpu.trace_start"() <{level = 10 : i32, message = "gqd,gkd->gqk"}> : () -> ()
    %cst_10 = arith.constant dense<0.000000e+00> : vector<8x8x8xf32>
    %52 = tpu.matmul %33, %42, %cst_10 {dimension_numbers = #tpu.dot_dimension_numbers<[2], [2], [1], [1], [0, 0, 0, 1, 1, 1], [0], [0]>} : vector<8x8x8xf32>, vector<8x8x8xf32>, vector<8x8x8xf32> -> vector<8x8x8xf32>
    "tpu.trace_stop"() : () -> ()
    %cst_11 = arith.constant dense<0xFF800000> : vector<8x8xf32>
    %53 = vector.multi_reduction <maximumf>, %52, %cst_11 [2] : vector<8x8x8xf32> to vector<8x8xf32>
    %54 = vector.shape_cast %53 : vector<8x8xf32> to vector<8x8x1xf32>
    %55 = vector.broadcast %54 : vector<8x8x1xf32> to vector<8x8x8xf32>
    %56 = arith.subf %52, %55 : vector<8x8x8xf32>
    %57 = math.exp %56 : vector<8x8x8xf32>
    %cst_12 = arith.constant dense<0.000000e+00> : vector<8x8xf32>
    %58 = vector.multi_reduction <add>, %57, %cst_12 [2] : vector<8x8x8xf32> to vector<8x8xf32>
    %59 = vector.shape_cast %58 : vector<8x8xf32> to vector<8x8x1xf32>
    %60 = vector.broadcast %59 : vector<8x8x1xf32> to vector<8x8x8xf32>
    %61 = arith.divf %57, %60 : vector<8x8x8xf32>
    "tpu.trace_start"() <{level = 10 : i32, message = "gqk,gkd->gqd"}> : () -> ()
    %cst_13 = arith.constant dense<0.000000e+00> : vector<8x8x8xf32>
    %62 = tpu.matmul %61, %51, %cst_13 {dimension_numbers = #tpu.dot_dimension_numbers<[2], [1], [1], [2], [0, 0, 0, 1, 1, 2], [0], [0]>} : vector<8x8x8xf32>, vector<8x8x8xf32>, vector<8x8x8xf32> -> vector<8x8x8xf32>
    "tpu.trace_stop"() : () -> ()
    %63 = vector.extract_strided_slice %62 {offsets = [0, 0, 0], sizes = [2, 8, 8], strides = [1, 1, 1]} : vector<8x8x8xf32> to vector<2x8x8xf32>
    %64 = vector.shape_cast %63 : vector<2x8x8xf32> to vector<16x8xf32>
    %65 = vector.extract_strided_slice %62 {offsets = [2, 0, 0], sizes = [2, 8, 8], strides = [1, 1, 1]} : vector<8x8x8xf32> to vector<2x8x8xf32>
    %66 = vector.shape_cast %65 : vector<2x8x8xf32> to vector<16x8xf32>
    %67 = vector.extract_strided_slice %62 {offsets = [4, 0, 0], sizes = [2, 8, 8], strides = [1, 1, 1]} : vector<8x8x8xf32> to vector<2x8x8xf32>
    %68 = vector.shape_cast %67 : vector<2x8x8xf32> to vector<16x8xf32>
    %69 = vector.extract_strided_slice %62 {offsets = [6, 0, 0], sizes = [2, 8, 8], strides = [1, 1, 1]} : vector<8x8x8xf32> to vector<2x8x8xf32>
    %70 = vector.shape_cast %69 : vector<2x8x8xf32> to vector<16x8xf32>
    %71 = tpu.concatenate %64, %66, %68, %70 in 1 : vector<16x8xf32>, vector<16x8xf32>, vector<16x8xf32>, vector<16x8xf32> -> vector<16x32xf32>
    %72 = vector.extract_strided_slice %8 {offsets = [0, 96], sizes = [32, 32], strides = [1, 1]} : vector<32x192xf32> to vector<32x32xf32>
    %cst_14 = arith.constant dense<0.000000e+00> : vector<16x32xf32>
    %73 = tpu.matmul %71, %72, %cst_14 {dimension_numbers = #tpu.dot_dimension_numbers<[1], [0], [0], [1], [0, 0, 1, 1], [], []>} : vector<16x32xf32>, vector<32x32xf32>, vector<16x32xf32> -> vector<16x32xf32>
    %74 = vector.extract_strided_slice %0 {offsets = [3, 0], sizes = [1, 32], strides = [1, 1]} : vector<21x32xf32> to vector<1x32xf32>
    %75 = vector.broadcast %74 : vector<1x32xf32> to vector<16x32xf32>
    %76 = arith.addf %73, %75 : vector<16x32xf32>
    %77 = arith.addf %6, %76 : vector<16x32xf32>
    %78 = vector.extract_strided_slice %0 {offsets = [4, 0], sizes = [1, 32], strides = [1, 1]} : vector<21x32xf32> to vector<1x32xf32>
    %79 = vector.extract_strided_slice %0 {offsets = [5, 0], sizes = [1, 32], strides = [1, 1]} : vector<21x32xf32> to vector<1x32xf32>
    %cst_15 = arith.constant dense<0.000000e+00> : vector<16xf32>
    %80 = vector.multi_reduction <add>, %77, %cst_15 [1] : vector<16x32xf32> to vector<16xf32>
    %81 = vector.shape_cast %80 : vector<16xf32> to vector<16x1xf32>
    %cst_16 = arith.constant 3.200000e+01 : f32
    %82 = vector.broadcast %cst_16 : f32 to vector<16x1xf32>
    %83 = arith.divf %81, %82 : vector<16x1xf32>
    %84 = vector.broadcast %83 : vector<16x1xf32> to vector<16x32xf32>
    %85 = arith.subf %77, %84 : vector<16x32xf32>
    %86 = arith.mulf %85, %85 : vector<16x32xf32>
    %cst_17 = arith.constant dense<0.000000e+00> : vector<16xf32>
    %87 = vector.multi_reduction <add>, %86, %cst_17 [1] : vector<16x32xf32> to vector<16xf32>
    %88 = vector.shape_cast %87 : vector<16xf32> to vector<16x1xf32>
    %cst_18 = arith.constant 3.200000e+01 : f32
    %89 = vector.broadcast %cst_18 : f32 to vector<16x1xf32>
    %90 = arith.divf %88, %89 : vector<16x1xf32>
    %91 = vector.broadcast %83 : vector<16x1xf32> to vector<16x32xf32>
    %92 = arith.subf %77, %91 : vector<16x32xf32>
    %cst_19 = arith.constant 9.99999974E-6 : f32
    %93 = vector.broadcast %cst_19 : f32 to vector<16x1xf32>
    %94 = arith.addf %90, %93 : vector<16x1xf32>
    %95 = math.rsqrt %94 : vector<16x1xf32>
    %96 = vector.broadcast %95 : vector<16x1xf32> to vector<16x32xf32>
    %97 = arith.mulf %92, %96 : vector<16x32xf32>
    %98 = vector.broadcast %78 : vector<1x32xf32> to vector<16x32xf32>
    %99 = arith.mulf %97, %98 : vector<16x32xf32>
    %100 = vector.broadcast %79 : vector<1x32xf32> to vector<16x32xf32>
    %101 = arith.addf %99, %100 : vector<16x32xf32>
    %102 = vector.extract_strided_slice %8 {offsets = [0, 128], sizes = [32, 32], strides = [1, 1]} : vector<32x192xf32> to vector<32x32xf32>
    %cst_20 = arith.constant dense<0.000000e+00> : vector<16x32xf32>
    %103 = tpu.matmul %101, %102, %cst_20 {dimension_numbers = #tpu.dot_dimension_numbers<[1], [0], [0], [1], [0, 0, 1, 1], [], []>} : vector<16x32xf32>, vector<32x32xf32>, vector<16x32xf32> -> vector<16x32xf32>
    %104 = vector.extract_strided_slice %0 {offsets = [6, 0], sizes = [1, 32], strides = [1, 1]} : vector<21x32xf32> to vector<1x32xf32>
    %105 = vector.broadcast %104 : vector<1x32xf32> to vector<16x32xf32>
    %106 = arith.addf %103, %105 : vector<16x32xf32>
    %cst_21 = arith.constant 0.000000e+00 : f32
    %107 = vector.broadcast %cst_21 : f32 to vector<16x32xf32>
    %108 = arith.maximumf %106, %107 : vector<16x32xf32>
    %109 = vector.extract_strided_slice %8 {offsets = [0, 160], sizes = [32, 32], strides = [1, 1]} : vector<32x192xf32> to vector<32x32xf32>
    %cst_22 = arith.constant dense<0.000000e+00> : vector<16x32xf32>
    %110 = tpu.matmul %108, %109, %cst_22 {dimension_numbers = #tpu.dot_dimension_numbers<[1], [0], [0], [1], [0, 0, 1, 1], [], []>} : vector<16x32xf32>, vector<32x32xf32>, vector<16x32xf32> -> vector<16x32xf32>
    %111 = vector.extract_strided_slice %0 {offsets = [7, 0], sizes = [1, 32], strides = [1, 1]} : vector<21x32xf32> to vector<1x32xf32>
    %112 = vector.broadcast %111 : vector<1x32xf32> to vector<16x32xf32>
    %113 = arith.addf %110, %112 : vector<16x32xf32>
    %114 = arith.addf %101, %113 : vector<16x32xf32>
    %115 = vector.extract_strided_slice %0 {offsets = [8, 0], sizes = [1, 32], strides = [1, 1]} : vector<21x32xf32> to vector<1x32xf32>
    %116 = vector.extract_strided_slice %0 {offsets = [9, 0], sizes = [1, 32], strides = [1, 1]} : vector<21x32xf32> to vector<1x32xf32>
    %cst_23 = arith.constant dense<0.000000e+00> : vector<16xf32>
    %117 = vector.multi_reduction <add>, %114, %cst_23 [1] : vector<16x32xf32> to vector<16xf32>
    %118 = vector.shape_cast %117 : vector<16xf32> to vector<16x1xf32>
    %cst_24 = arith.constant 3.200000e+01 : f32
    %119 = vector.broadcast %cst_24 : f32 to vector<16x1xf32>
    %120 = arith.divf %118, %119 : vector<16x1xf32>
    %121 = vector.broadcast %120 : vector<16x1xf32> to vector<16x32xf32>
    %122 = arith.subf %114, %121 : vector<16x32xf32>
    %123 = arith.mulf %122, %122 : vector<16x32xf32>
    %cst_25 = arith.constant dense<0.000000e+00> : vector<16xf32>
    %124 = vector.multi_reduction <add>, %123, %cst_25 [1] : vector<16x32xf32> to vector<16xf32>
    %125 = vector.shape_cast %124 : vector<16xf32> to vector<16x1xf32>
    %cst_26 = arith.constant 3.200000e+01 : f32
    %126 = vector.broadcast %cst_26 : f32 to vector<16x1xf32>
    %127 = arith.divf %125, %126 : vector<16x1xf32>
    %128 = vector.broadcast %120 : vector<16x1xf32> to vector<16x32xf32>
    %129 = arith.subf %114, %128 : vector<16x32xf32>
    %cst_27 = arith.constant 9.99999974E-6 : f32
    %130 = vector.broadcast %cst_27 : f32 to vector<16x1xf32>
    %131 = arith.addf %127, %130 : vector<16x1xf32>
    %132 = math.rsqrt %131 : vector<16x1xf32>
    %133 = vector.broadcast %132 : vector<16x1xf32> to vector<16x32xf32>
    %134 = arith.mulf %129, %133 : vector<16x32xf32>
    %135 = vector.broadcast %115 : vector<1x32xf32> to vector<16x32xf32>
    %136 = arith.mulf %134, %135 : vector<16x32xf32>
    %137 = vector.broadcast %116 : vector<1x32xf32> to vector<16x32xf32>
    %138 = arith.addf %136, %137 : vector<16x32xf32>
    %c1 = arith.constant 1 : index
    %c0_28 = arith.constant 0 : index
    %c0_29 = arith.constant 0 : index
    %139 = vector.load %arg2[%c1, %c0_28, %c0_29] : memref<2x32x192xf32, #tpu.memory_space<vmem>>, vector<1x32x192xf32>
    %140 = vector.shape_cast %139 : vector<1x32x192xf32> to vector<32x192xf32>
    %141 = vector.extract_strided_slice %140 {offsets = [0, 0], sizes = [32, 96], strides = [1, 1]} : vector<32x192xf32> to vector<32x96xf32>
    %cst_30 = arith.constant dense<0.000000e+00> : vector<16x96xf32>
    %142 = tpu.matmul %138, %141, %cst_30 {dimension_numbers = #tpu.dot_dimension_numbers<[1], [0], [0], [1], [0, 0, 1, 1], [], []>} : vector<16x32xf32>, vector<32x96xf32>, vector<16x96xf32> -> vector<16x96xf32>
    %143 = vector.extract_strided_slice %142 {offsets = [0, 0], sizes = [16, 32], strides = [1, 1]} : vector<16x96xf32> to vector<16x32xf32>
    %144 = vector.extract_strided_slice %0 {offsets = [10, 0], sizes = [1, 32], strides = [1, 1]} : vector<21x32xf32> to vector<1x32xf32>
    %145 = vector.broadcast %144 : vector<1x32xf32> to vector<16x32xf32>
    %146 = arith.addf %143, %145 : vector<16x32xf32>
    %cst_31 = arith.constant 0.353553385 : f32
    %147 = vector.broadcast %cst_31 : f32 to vector<16x32xf32>
    %148 = arith.mulf %146, %147 : vector<16x32xf32>
    %149 = vector.extract_strided_slice %142 {offsets = [0, 32], sizes = [16, 32], strides = [1, 1]} : vector<16x96xf32> to vector<16x32xf32>
    %150 = vector.extract_strided_slice %0 {offsets = [11, 0], sizes = [1, 32], strides = [1, 1]} : vector<21x32xf32> to vector<1x32xf32>
    %151 = vector.broadcast %150 : vector<1x32xf32> to vector<16x32xf32>
    %152 = arith.addf %149, %151 : vector<16x32xf32>
    %153 = vector.extract_strided_slice %142 {offsets = [0, 64], sizes = [16, 32], strides = [1, 1]} : vector<16x96xf32> to vector<16x32xf32>
    %154 = vector.extract_strided_slice %0 {offsets = [12, 0], sizes = [1, 32], strides = [1, 1]} : vector<21x32xf32> to vector<1x32xf32>
    %155 = vector.broadcast %154 : vector<1x32xf32> to vector<16x32xf32>
    %156 = arith.addf %153, %155 : vector<16x32xf32>
    %157 = vector.extract_strided_slice %148 {offsets = [0, 0], sizes = [16, 8], strides = [1, 1]} : vector<16x32xf32> to vector<16x8xf32>
    %158 = vector.shape_cast %157 : vector<16x8xf32> to vector<2x8x8xf32>
    %159 = vector.extract_strided_slice %148 {offsets = [0, 8], sizes = [16, 8], strides = [1, 1]} : vector<16x32xf32> to vector<16x8xf32>
    %160 = vector.shape_cast %159 : vector<16x8xf32> to vector<2x8x8xf32>
    %161 = vector.extract_strided_slice %148 {offsets = [0, 16], sizes = [16, 8], strides = [1, 1]} : vector<16x32xf32> to vector<16x8xf32>
    %162 = vector.shape_cast %161 : vector<16x8xf32> to vector<2x8x8xf32>
    %163 = vector.extract_strided_slice %148 {offsets = [0, 24], sizes = [16, 8], strides = [1, 1]} : vector<16x32xf32> to vector<16x8xf32>
    %164 = vector.shape_cast %163 : vector<16x8xf32> to vector<2x8x8xf32>
    %165 = tpu.concatenate %158, %160, %162, %164 in 0 : vector<2x8x8xf32>, vector<2x8x8xf32>, vector<2x8x8xf32>, vector<2x8x8xf32> -> vector<8x8x8xf32>
    %166 = vector.extract_strided_slice %152 {offsets = [0, 0], sizes = [16, 8], strides = [1, 1]} : vector<16x32xf32> to vector<16x8xf32>
    %167 = vector.shape_cast %166 : vector<16x8xf32> to vector<2x8x8xf32>
    %168 = vector.extract_strided_slice %152 {offsets = [0, 8], sizes = [16, 8], strides = [1, 1]} : vector<16x32xf32> to vector<16x8xf32>
    %169 = vector.shape_cast %168 : vector<16x8xf32> to vector<2x8x8xf32>
    %170 = vector.extract_strided_slice %152 {offsets = [0, 16], sizes = [16, 8], strides = [1, 1]} : vector<16x32xf32> to vector<16x8xf32>
    %171 = vector.shape_cast %170 : vector<16x8xf32> to vector<2x8x8xf32>
    %172 = vector.extract_strided_slice %152 {offsets = [0, 24], sizes = [16, 8], strides = [1, 1]} : vector<16x32xf32> to vector<16x8xf32>
    %173 = vector.shape_cast %172 : vector<16x8xf32> to vector<2x8x8xf32>
    %174 = tpu.concatenate %167, %169, %171, %173 in 0 : vector<2x8x8xf32>, vector<2x8x8xf32>, vector<2x8x8xf32>, vector<2x8x8xf32> -> vector<8x8x8xf32>
    %175 = vector.extract_strided_slice %156 {offsets = [0, 0], sizes = [16, 8], strides = [1, 1]} : vector<16x32xf32> to vector<16x8xf32>
    %176 = vector.shape_cast %175 : vector<16x8xf32> to vector<2x8x8xf32>
    %177 = vector.extract_strided_slice %156 {offsets = [0, 8], sizes = [16, 8], strides = [1, 1]} : vector<16x32xf32> to vector<16x8xf32>
    %178 = vector.shape_cast %177 : vector<16x8xf32> to vector<2x8x8xf32>
    %179 = vector.extract_strided_slice %156 {offsets = [0, 16], sizes = [16, 8], strides = [1, 1]} : vector<16x32xf32> to vector<16x8xf32>
    %180 = vector.shape_cast %179 : vector<16x8xf32> to vector<2x8x8xf32>
    %181 = vector.extract_strided_slice %156 {offsets = [0, 24], sizes = [16, 8], strides = [1, 1]} : vector<16x32xf32> to vector<16x8xf32>
    %182 = vector.shape_cast %181 : vector<16x8xf32> to vector<2x8x8xf32>
    %183 = tpu.concatenate %176, %178, %180, %182 in 0 : vector<2x8x8xf32>, vector<2x8x8xf32>, vector<2x8x8xf32>, vector<2x8x8xf32> -> vector<8x8x8xf32>
    "tpu.trace_start"() <{level = 10 : i32, message = "gqd,gkd->gqk"}> : () -> ()
    %cst_32 = arith.constant dense<0.000000e+00> : vector<8x8x8xf32>
    %184 = tpu.matmul %165, %174, %cst_32 {dimension_numbers = #tpu.dot_dimension_numbers<[2], [2], [1], [1], [0, 0, 0, 1, 1, 1], [0], [0]>} : vector<8x8x8xf32>, vector<8x8x8xf32>, vector<8x8x8xf32> -> vector<8x8x8xf32>
    "tpu.trace_stop"() : () -> ()
    %cst_33 = arith.constant dense<0xFF800000> : vector<8x8xf32>
    %185 = vector.multi_reduction <maximumf>, %184, %cst_33 [2] : vector<8x8x8xf32> to vector<8x8xf32>
    %186 = vector.shape_cast %185 : vector<8x8xf32> to vector<8x8x1xf32>
    %187 = vector.broadcast %186 : vector<8x8x1xf32> to vector<8x8x8xf32>
    %188 = arith.subf %184, %187 : vector<8x8x8xf32>
    %189 = math.exp %188 : vector<8x8x8xf32>
    %cst_34 = arith.constant dense<0.000000e+00> : vector<8x8xf32>
    %190 = vector.multi_reduction <add>, %189, %cst_34 [2] : vector<8x8x8xf32> to vector<8x8xf32>
    %191 = vector.shape_cast %190 : vector<8x8xf32> to vector<8x8x1xf32>
    %192 = vector.broadcast %191 : vector<8x8x1xf32> to vector<8x8x8xf32>
    %193 = arith.divf %189, %192 : vector<8x8x8xf32>
    "tpu.trace_start"() <{level = 10 : i32, message = "gqk,gkd->gqd"}> : () -> ()
    %cst_35 = arith.constant dense<0.000000e+00> : vector<8x8x8xf32>
    %194 = tpu.matmul %193, %183, %cst_35 {dimension_numbers = #tpu.dot_dimension_numbers<[2], [1], [1], [2], [0, 0, 0, 1, 1, 2], [0], [0]>} : vector<8x8x8xf32>, vector<8x8x8xf32>, vector<8x8x8xf32> -> vector<8x8x8xf32>
    "tpu.trace_stop"() : () -> ()
    %195 = vector.extract_strided_slice %194 {offsets = [0, 0, 0], sizes = [2, 8, 8], strides = [1, 1, 1]} : vector<8x8x8xf32> to vector<2x8x8xf32>
    %196 = vector.shape_cast %195 : vector<2x8x8xf32> to vector<16x8xf32>
    %197 = vector.extract_strided_slice %194 {offsets = [2, 0, 0], sizes = [2, 8, 8], strides = [1, 1, 1]} : vector<8x8x8xf32> to vector<2x8x8xf32>
    %198 = vector.shape_cast %197 : vector<2x8x8xf32> to vector<16x8xf32>
    %199 = vector.extract_strided_slice %194 {offsets = [4, 0, 0], sizes = [2, 8, 8], strides = [1, 1, 1]} : vector<8x8x8xf32> to vector<2x8x8xf32>
    %200 = vector.shape_cast %199 : vector<2x8x8xf32> to vector<16x8xf32>
    %201 = vector.extract_strided_slice %194 {offsets = [6, 0, 0], sizes = [2, 8, 8], strides = [1, 1, 1]} : vector<8x8x8xf32> to vector<2x8x8xf32>
    %202 = vector.shape_cast %201 : vector<2x8x8xf32> to vector<16x8xf32>
    %203 = tpu.concatenate %196, %198, %200, %202 in 1 : vector<16x8xf32>, vector<16x8xf32>, vector<16x8xf32>, vector<16x8xf32> -> vector<16x32xf32>
    %204 = vector.extract_strided_slice %140 {offsets = [0, 96], sizes = [32, 32], strides = [1, 1]} : vector<32x192xf32> to vector<32x32xf32>
    %cst_36 = arith.constant dense<0.000000e+00> : vector<16x32xf32>
    %205 = tpu.matmul %203, %204, %cst_36 {dimension_numbers = #tpu.dot_dimension_numbers<[1], [0], [0], [1], [0, 0, 1, 1], [], []>} : vector<16x32xf32>, vector<32x32xf32>, vector<16x32xf32> -> vector<16x32xf32>
    %206 = vector.extract_strided_slice %0 {offsets = [13, 0], sizes = [1, 32], strides = [1, 1]} : vector<21x32xf32> to vector<1x32xf32>
    %207 = vector.broadcast %206 : vector<1x32xf32> to vector<16x32xf32>
    %208 = arith.addf %205, %207 : vector<16x32xf32>
    %209 = arith.addf %138, %208 : vector<16x32xf32>
    %210 = vector.extract_strided_slice %0 {offsets = [14, 0], sizes = [1, 32], strides = [1, 1]} : vector<21x32xf32> to vector<1x32xf32>
    %211 = vector.extract_strided_slice %0 {offsets = [15, 0], sizes = [1, 32], strides = [1, 1]} : vector<21x32xf32> to vector<1x32xf32>
    %cst_37 = arith.constant dense<0.000000e+00> : vector<16xf32>
    %212 = vector.multi_reduction <add>, %209, %cst_37 [1] : vector<16x32xf32> to vector<16xf32>
    %213 = vector.shape_cast %212 : vector<16xf32> to vector<16x1xf32>
    %cst_38 = arith.constant 3.200000e+01 : f32
    %214 = vector.broadcast %cst_38 : f32 to vector<16x1xf32>
    %215 = arith.divf %213, %214 : vector<16x1xf32>
    %216 = vector.broadcast %215 : vector<16x1xf32> to vector<16x32xf32>
    %217 = arith.subf %209, %216 : vector<16x32xf32>
    %218 = arith.mulf %217, %217 : vector<16x32xf32>
    %cst_39 = arith.constant dense<0.000000e+00> : vector<16xf32>
    %219 = vector.multi_reduction <add>, %218, %cst_39 [1] : vector<16x32xf32> to vector<16xf32>
    %220 = vector.shape_cast %219 : vector<16xf32> to vector<16x1xf32>
    %cst_40 = arith.constant 3.200000e+01 : f32
    %221 = vector.broadcast %cst_40 : f32 to vector<16x1xf32>
    %222 = arith.divf %220, %221 : vector<16x1xf32>
    %223 = vector.broadcast %215 : vector<16x1xf32> to vector<16x32xf32>
    %224 = arith.subf %209, %223 : vector<16x32xf32>
    %cst_41 = arith.constant 9.99999974E-6 : f32
    %225 = vector.broadcast %cst_41 : f32 to vector<16x1xf32>
    %226 = arith.addf %222, %225 : vector<16x1xf32>
    %227 = math.rsqrt %226 : vector<16x1xf32>
    %228 = vector.broadcast %227 : vector<16x1xf32> to vector<16x32xf32>
    %229 = arith.mulf %224, %228 : vector<16x32xf32>
    %230 = vector.broadcast %210 : vector<1x32xf32> to vector<16x32xf32>
    %231 = arith.mulf %229, %230 : vector<16x32xf32>
    %232 = vector.broadcast %211 : vector<1x32xf32> to vector<16x32xf32>
    %233 = arith.addf %231, %232 : vector<16x32xf32>
    %234 = vector.extract_strided_slice %140 {offsets = [0, 128], sizes = [32, 32], strides = [1, 1]} : vector<32x192xf32> to vector<32x32xf32>
    %cst_42 = arith.constant dense<0.000000e+00> : vector<16x32xf32>
    %235 = tpu.matmul %233, %234, %cst_42 {dimension_numbers = #tpu.dot_dimension_numbers<[1], [0], [0], [1], [0, 0, 1, 1], [], []>} : vector<16x32xf32>, vector<32x32xf32>, vector<16x32xf32> -> vector<16x32xf32>
    %236 = vector.extract_strided_slice %0 {offsets = [16, 0], sizes = [1, 32], strides = [1, 1]} : vector<21x32xf32> to vector<1x32xf32>
    %237 = vector.broadcast %236 : vector<1x32xf32> to vector<16x32xf32>
    %238 = arith.addf %235, %237 : vector<16x32xf32>
    %cst_43 = arith.constant 0.000000e+00 : f32
    %239 = vector.broadcast %cst_43 : f32 to vector<16x32xf32>
    %240 = arith.maximumf %238, %239 : vector<16x32xf32>
    %241 = vector.extract_strided_slice %140 {offsets = [0, 160], sizes = [32, 32], strides = [1, 1]} : vector<32x192xf32> to vector<32x32xf32>
    %cst_44 = arith.constant dense<0.000000e+00> : vector<16x32xf32>
    %242 = tpu.matmul %240, %241, %cst_44 {dimension_numbers = #tpu.dot_dimension_numbers<[1], [0], [0], [1], [0, 0, 1, 1], [], []>} : vector<16x32xf32>, vector<32x32xf32>, vector<16x32xf32> -> vector<16x32xf32>
    %243 = vector.extract_strided_slice %0 {offsets = [17, 0], sizes = [1, 32], strides = [1, 1]} : vector<21x32xf32> to vector<1x32xf32>
    %244 = vector.broadcast %243 : vector<1x32xf32> to vector<16x32xf32>
    %245 = arith.addf %242, %244 : vector<16x32xf32>
    %246 = arith.addf %233, %245 : vector<16x32xf32>
    %247 = vector.extract_strided_slice %0 {offsets = [18, 0], sizes = [1, 32], strides = [1, 1]} : vector<21x32xf32> to vector<1x32xf32>
    %248 = vector.extract_strided_slice %0 {offsets = [19, 0], sizes = [1, 32], strides = [1, 1]} : vector<21x32xf32> to vector<1x32xf32>
    %cst_45 = arith.constant dense<0.000000e+00> : vector<16xf32>
    %249 = vector.multi_reduction <add>, %246, %cst_45 [1] : vector<16x32xf32> to vector<16xf32>
    %250 = vector.shape_cast %249 : vector<16xf32> to vector<16x1xf32>
    %cst_46 = arith.constant 3.200000e+01 : f32
    %251 = vector.broadcast %cst_46 : f32 to vector<16x1xf32>
    %252 = arith.divf %250, %251 : vector<16x1xf32>
    %253 = vector.broadcast %252 : vector<16x1xf32> to vector<16x32xf32>
    %254 = arith.subf %246, %253 : vector<16x32xf32>
    %255 = arith.mulf %254, %254 : vector<16x32xf32>
    %cst_47 = arith.constant dense<0.000000e+00> : vector<16xf32>
    %256 = vector.multi_reduction <add>, %255, %cst_47 [1] : vector<16x32xf32> to vector<16xf32>
    %257 = vector.shape_cast %256 : vector<16xf32> to vector<16x1xf32>
    %cst_48 = arith.constant 3.200000e+01 : f32
    %258 = vector.broadcast %cst_48 : f32 to vector<16x1xf32>
    %259 = arith.divf %257, %258 : vector<16x1xf32>
    %260 = vector.broadcast %252 : vector<16x1xf32> to vector<16x32xf32>
    %261 = arith.subf %246, %260 : vector<16x32xf32>
    %cst_49 = arith.constant 9.99999974E-6 : f32
    %262 = vector.broadcast %cst_49 : f32 to vector<16x1xf32>
    %263 = arith.addf %259, %262 : vector<16x1xf32>
    %264 = math.rsqrt %263 : vector<16x1xf32>
    %265 = vector.broadcast %264 : vector<16x1xf32> to vector<16x32xf32>
    %266 = arith.mulf %261, %265 : vector<16x32xf32>
    %267 = vector.broadcast %247 : vector<1x32xf32> to vector<16x32xf32>
    %268 = arith.mulf %266, %267 : vector<16x32xf32>
    %269 = vector.broadcast %248 : vector<1x32xf32> to vector<16x32xf32>
    %270 = arith.addf %268, %269 : vector<16x32xf32>
    %c0_50 = arith.constant 0 : index
    %c0_51 = arith.constant 0 : index
    %271 = vector.load %arg3[%c0_50, %c0_51] : memref<32x32xf32, #tpu.memory_space<vmem>>, vector<32x32xf32>
    %cst_52 = arith.constant dense<0.000000e+00> : vector<16x32xf32>
    %272 = tpu.matmul %270, %271, %cst_52 {dimension_numbers = #tpu.dot_dimension_numbers<[1], [0], [0], [1], [0, 0, 1, 1], [], []>} : vector<16x32xf32>, vector<32x32xf32>, vector<16x32xf32> -> vector<16x32xf32>
    %273 = vector.extract_strided_slice %0 {offsets = [20, 0], sizes = [1, 32], strides = [1, 1]} : vector<21x32xf32> to vector<1x32xf32>
    %274 = vector.broadcast %273 : vector<1x32xf32> to vector<16x32xf32>
    %275 = arith.addf %272, %274 : vector<16x32xf32>
    %276 = vector.shape_cast %275 : vector<16x32xf32> to vector<2x8x32xf32>
    %277 = vector.extract_strided_slice %276 {offsets = [0, 0, 0], sizes = [2, 1, 32], strides = [1, 1, 1]} : vector<2x8x32xf32> to vector<2x1x32xf32>
    %278 = vector.shape_cast %277 : vector<2x1x32xf32> to vector<2x32xf32>
    %279 = vector.extract_strided_slice %276 {offsets = [0, 1, 0], sizes = [2, 1, 32], strides = [1, 1, 1]} : vector<2x8x32xf32> to vector<2x1x32xf32>
    %280 = vector.shape_cast %279 : vector<2x1x32xf32> to vector<2x32xf32>
    %281 = vector.extract_strided_slice %276 {offsets = [0, 2, 0], sizes = [2, 1, 32], strides = [1, 1, 1]} : vector<2x8x32xf32> to vector<2x1x32xf32>
    %282 = vector.shape_cast %281 : vector<2x1x32xf32> to vector<2x32xf32>
    %283 = vector.extract_strided_slice %276 {offsets = [0, 3, 0], sizes = [2, 1, 32], strides = [1, 1, 1]} : vector<2x8x32xf32> to vector<2x1x32xf32>
    %284 = vector.shape_cast %283 : vector<2x1x32xf32> to vector<2x32xf32>
    %285 = vector.extract_strided_slice %276 {offsets = [0, 4, 0], sizes = [2, 1, 32], strides = [1, 1, 1]} : vector<2x8x32xf32> to vector<2x1x32xf32>
    %286 = vector.shape_cast %285 : vector<2x1x32xf32> to vector<2x32xf32>
    %287 = vector.extract_strided_slice %276 {offsets = [0, 5, 0], sizes = [2, 1, 32], strides = [1, 1, 1]} : vector<2x8x32xf32> to vector<2x1x32xf32>
    %288 = vector.shape_cast %287 : vector<2x1x32xf32> to vector<2x32xf32>
    %289 = vector.extract_strided_slice %276 {offsets = [0, 6, 0], sizes = [2, 1, 32], strides = [1, 1, 1]} : vector<2x8x32xf32> to vector<2x1x32xf32>
    %290 = vector.shape_cast %289 : vector<2x1x32xf32> to vector<2x32xf32>
    %291 = vector.extract_strided_slice %276 {offsets = [0, 7, 0], sizes = [2, 1, 32], strides = [1, 1, 1]} : vector<2x8x32xf32> to vector<2x1x32xf32>
    %292 = vector.shape_cast %291 : vector<2x1x32xf32> to vector<2x32xf32>
    %293 = tpu.concatenate %278, %280, %282, %284, %286, %288, %290, %292 in 1 : vector<2x32xf32>, vector<2x32xf32>, vector<2x32xf32>, vector<2x32xf32>, vector<2x32xf32>, vector<2x32xf32>, vector<2x32xf32>, vector<2x32xf32> -> vector<2x256xf32>
    %c0_53 = arith.constant 0 : index
    %c0_54 = arith.constant 0 : index
    %294 = vector.load %arg5[%c0_53, %c0_54] : memref<2x256xf32, #tpu.memory_space<vmem>>, vector<2x256xf32>
    tpu.vector_store %arg5[%c0_53, %c0_54], %293 {strides = array<i32>} : memref<2x256xf32, #tpu.memory_space<vmem>>, vector<2x256xf32>,
    return
  }
}

</mosaic_0001>

<bundles_post_ra>
// kernel: tpu_custom_call.1
= control target key start
LH: loop header
LB: loop body
LE: loop exit
PB: predicated region body
PF: predicated region fallthrough
CT: control target
= control target key end

     0   :  { %10 = vsyncpa [#allocation3], 0  ;;  %s5451_s0 = inlined_call_operand.hbm [shape: f32[2,8,32], index: 0, kind: input, shape index: {}]   ;;  %s5452_s1 = inlined_call_operand.hbm [shape: f32[8,32], index: 1, kind: input, shape index: {}]   ;;  %s5453_s2 = inlined_call_operand.hbm [shape: f32[2,32,192], index: 2, kind: input, shape index: {}]   ;;  %s5454_s3 = inlined_call_operand.hbm [shape: f32[32,32], index: 3, kind: input, shape index: {}]   ;;  %s5455_s4 = inlined_call_operand.hbm [shape: f32[21,32], index: 4, kind: input, shape index: {}]   ;;  %s5456_s5 = inlined_call_operand.hbm [shape: f32[2,256], index: 5, kind: output, shape index: {}]  }
   0x1   :  { %11 = vsyncpa [#allocation6], 0 }
   0x2   :  { %12 = vsyncpa [#allocation9], 0 }
   0x3   :  { %13 = vsyncpa [#allocation4], 0  ;;  %s4791_s18 = smov [#allocation5]   ;;  %s4651_s22 = scalar_lea.hbm %s5452_s1, 128 }
   0x4   :  { %s32_s19 = sshll.u32 %s4791_s18, 4  ;;  %p4652_p0 = scmp.ne.s32.totalorder %s5452_s1, %s4651_s22  ;;  %s33_s19 = int_to_ptr.vmem [resolvable:$true] %s32_s19 }
   0x5   :  { %p4655_p1 = scmp.lt.u32.totalorder %s4651_s22, %s5452_s1 }
   0x7   :  { %p4657_p2 = pnand %p4655_p1, %p4652_p0 }
   0x9   :  { %4660 = shalt.err (!%p4657_p2)
}
   0xa   :  { %s4661_s27 = scalar_lea.vmem %s33_s19, 128  ;;  %p4666_p4 = scmp.lt.s32.totalorder %s33_s19, %s33_s19 }
   0xb   :  { %p4662_p3 = scmp.ne.s32.totalorder %s33_s19, %s4661_s27  ;;  %p4667_p5 = scmp.lt.s32.totalorder %s4661_s27, %s4661_s27 }
   0xd   :  { %p4668_p6 = por %p4667_p5, %p4666_p4 }
   0xf   :  { %p4669_p7 = pnand %p4668_p6, %p4662_p3 }
  0x11   :  { %4672 = shalt.err (!%p4669_p7)
}
  0x12   :  { %35 = dma.hbm_to_vmem [thread:$0]  %s5452_s1, 128, %s33_s19, [#allocation6]  }
  0x13   :  { %s4792_s30 = smov [#allocation8]   ;;  %s4793_s7 = smov [#allocation2]  }
  0x14   :  { %s53_s6 = sshll.u32 %s4792_s30, 4  ;;  %s19_s8 = sshll.u32 %s4793_s7, 4  ;;  %s54_s6 = int_to_ptr.vmem [resolvable:$true] %s53_s6  ;;  %s20_s8 = int_to_ptr.vmem [resolvable:$true] %s19_s8 }
  0x15   :  { %s4673_s11 = scalar_lea.hbm %s5454_s3, 512 }
  0x16   :  { %p4674_p8 = scmp.ne.s32.totalorder %s5454_s3, %s4673_s11  ;;  %p4677_p9 = scmp.lt.u32.totalorder %s4673_s11, %s5454_s3 }
  0x18   :  { %p4679_p10 = pnand %p4677_p9, %p4674_p8 }
  0x1a   :  { %4682 = shalt.err (!%p4679_p10)
}
  0x1b   :  { %s4683_s1 = scalar_lea.vmem %s54_s6, 512  ;;  %p4688_p12 = scmp.lt.s32.totalorder %s54_s6, %s54_s6 }
  0x1c   :  { %p4684_p11 = scmp.ne.s32.totalorder %s54_s6, %s4683_s1  ;;  %p4689_p13 = scmp.lt.s32.totalorder %s4683_s1, %s4683_s1 }
  0x1e   :  { %p4690_p0 = por %p4689_p13, %p4688_p12 }
  0x20   :  { %p4691_p1 = pnand %p4690_p0, %p4684_p11 }
  0x22   :  { %4694 = shalt.err (!%p4691_p1)
}
  0x23   :  { %s4794_s16 = smov 128   ;;  %s4795_s17 = smov 8  }
  0x24   :  { %59 = dma.hbm_to_vmem [thread:$0]  %s5454_s3, 512, %s54_s6, [#allocation9], %s4794_s16, %s4794_s16, %s4795_s17  }
  0x25   :  { %s4695_s22 = scalar_lea.hbm %s5451_s0, 256 }
  0x26   :  { %p4696_p2 = scmp.ne.s32.totalorder %s5451_s0, %s4695_s22  ;;  %p4699_p3 = scmp.lt.u32.totalorder %s4695_s22, %s5451_s0 }
  0x28   :  { %p4701_p4 = pnand %p4699_p3, %p4696_p2 }
  0x2a   :  { %4704 = shalt.err (!%p4701_p4)
}
  0x2b   :  { %s4705_s27 = scalar_lea.vmem %s20_s8, 256  ;;  %p4710_p6 = scmp.lt.s32.totalorder %s20_s8, %s20_s8 }
  0x2c   :  { %p4706_p5 = scmp.ne.s32.totalorder %s20_s8, %s4705_s27  ;;  %p4711_p7 = scmp.lt.s32.totalorder %s4705_s27, %s4705_s27 }
  0x2e   :  { %p4712_p8 = por %p4711_p7, %p4710_p6 }
  0x30   :  { %p4713_p9 = pnand %p4712_p8, %p4706_p5 }
  0x32   :  { %4716 = shalt.err (!%p4713_p9)
}
  0x33   :  { %25 = dma.hbm_to_vmem [thread:$0]  %s5451_s0, 256, %s20_s8, [#allocation3], %s4794_s16, %s4794_s16, %s4795_s17  }
  0x34   :  { %s4796_s29 = smov [#allocation7]   ;;  %s4717_s9 = scalar_lea.hbm %s5453_s2, 2048 }
  0x35   :  { %s41_s30 = sshll.u32 %s4796_s29, 4  ;;  %p4718_p10 = scmp.ne.s32.totalorder %s5453_s2, %s4717_s9  ;;  %s42_s30 = int_to_ptr.vmem [resolvable:$true] %s41_s30 }
  0x36   :  { %p4721_p11 = scmp.lt.u32.totalorder %s4717_s9, %s5453_s2 }
  0x38   :  { %p4723_p12 = pnand %p4721_p11, %p4718_p10 }
  0x3a   :  { %4726 = shalt.err (!%p4723_p12)
}
  0x3b   :  { %s4727_s14 = scalar_lea.vmem %s42_s30, 2048  ;;  %p4732_p0 = scmp.lt.s32.totalorder %s42_s30, %s42_s30 }
  0x3c   :  { %p4728_p13 = scmp.ne.s32.totalorder %s42_s30, %s4727_s14  ;;  %p4733_p1 = scmp.lt.s32.totalorder %s4727_s14, %s4727_s14 }
  0x3e   :  { %p4734_p2 = por %p4733_p1, %p4732_p0 }
  0x40   :  { %p4735_p3 = pnand %p4734_p2, %p4728_p13 }
  0x42   :  { %4738 = shalt.err (!%p4735_p3)
}
  0x43   :  { %s4797_s0 = smov 256   ;;  %s4798_s8 = smov 16  }
  0x44   :  { %47 = dma.hbm_to_vmem [thread:$0]  %s5453_s2, 2048, %s42_s30, [#allocation6], %s4797_s0, %s4797_s0, %s4798_s8  }
  0x45   :  { %s4799_s18 = smov [#allocation10]   ;;  %s4739_s22 = scalar_lea.hbm %s5455_s4, 384 }
  0x46   :  { %s65_s19 = sshll.u32 %s4799_s18, 4  ;;  %p4740_p4 = scmp.ne.s32.totalorder %s5455_s4, %s4739_s22  ;;  %s66_s19 = int_to_ptr.vmem [resolvable:$true] %s65_s19 }
  0x47   :  { %p4743_p5 = scmp.lt.u32.totalorder %s4739_s22, %s5455_s4 }
  0x49   :  { %p4745_p6 = pnand %p4743_p5, %p4740_p4 }
  0x4b   :  { %4748 = shalt.err (!%p4745_p6)
}
  0x4c   :  { %s4749_s27 = scalar_lea.vmem %s66_s19, 384  ;;  %p4754_p8 = scmp.lt.s32.totalorder %s66_s19, %s66_s19 }
  0x4d   :  { %p4750_p7 = scmp.ne.s32.totalorder %s66_s19, %s4749_s27  ;;  %p4755_p9 = scmp.lt.s32.totalorder %s4749_s27, %s4749_s27 }
  0x4f   :  { %p4756_p10 = por %p4755_p9, %p4754_p8 }
  0x51   :  { %p4757_p11 = pnand %p4756_p10, %p4750_p7 }
  0x53   :  { %4760 = shalt.err (!%p4757_p11)
}
  0x54   :  { %71 = dma.hbm_to_vmem [thread:$0]  %s5455_s4, 384, %s66_s19, [#allocation9], %s4794_s16, %s4794_s16, %s4795_s17  }
  0x55   :  { %4783 = dma.done.wait [#allocation3], 256  }
  0x56   :  { %4784 = vsyncadd [#allocation3], 4294967040 }
  0x57   :  { %4785 = dma.done.wait [#allocation6], 2176  }
  0x58   :  { %4786 = vsyncadd [#allocation6], 4294965120 }
  0x59   :  { %4787 = dma.done.wait [#allocation9], 896  }
  0x5a   :  { %4788 = vsyncadd [#allocation9], 4294966400  ;;  %v185_v0 = vlaneseq  ;;  %v4915_v3 = vld [vmem:[#allocation7] sm:$0xff]  ;;  %v4917_v4 = vld [vmem:[#allocation7 + $0x10] sm:$0xff]  ;;  %vm103_vm0 = vcmask 261120   ;;  %s4800_s4 = smov 32  }
  0x5b   :  { %v4919_v5 = vld [vmem:[#allocation7 + $0x20] sm:$0xff]  ;;  %v4531_v6 = vpack.i.bf16 %v4917_v4, %v4915_v3  ;;  %v4440_v7 = vpack.c.bf16 %v4917_v4, %v4915_v3  ;;  %v4925_v8 = vld [vmem:[#allocation7 + $0x30] sm:$0xff]  ;;  %v90_v9 = vld [vmem:[#allocation2] sm:$0xff]  ;;  %v4801_v19 = vmov 0.0   ;;  %s4802_s16 = smov 120   ;;  %vm4803_vm1 = vmmov 0  }
  0x5c   :  { %v4910_v1 = vshrl.u32 %v185_v0, 7  ;;  %v4444_v10 = vpack.c.bf16 %v4925_v8, %v4919_v5  ;;  %v92_v11 = vld [vmem:[#allocation5] sm:$0xff]  ;;  %v4929_v12 = vld [vmem:[#allocation10] sm:$0xff]  ;;  %v91_v15 = vld [vmem:[#allocation2 + $0x8] sm:$0xff]  ;;  %4192 = vmatprep.subr.mxu1 %v4801_v19  ;;  %4194 = vmatprep.mubr.msk.f32.mxu1 %vm4803_vm1, %v4801_v19  ;;  %s4804_s28 = smov 112   ;;  %s4805_s29 = smov 104  }
  0x5d   :  { %4441 = vmatprep.subr.bf16.mxu0 %v4440_v7  ;;  %v4931_v13 = vadd.f32 %v92_v11, %v90_v9  ;;  %v4938_v16 = vadd.f32 %v92_v11, %v91_v15  ;;  %s4806_s30 = smov 96   ;;  %vm257_vm2 = vcmask 64512   ;;  %s4807_s6 = smov 64   ;;  %vm1586_vm3 = vcmask 130048  }
  0x5e   :  { %v4913_v2 = vsub.s32 1, %v4910_v1  ;;  %4443 = vmatpush3.bf16.msra.mxu0 %v4440_v7  ;;  %v4955_v23 = vsub.s32 0, %v4910_v1  ;;  %v4980_v35 = vsub.s32 2, %v4910_v1  ;;  %s4808_s7 = smov 24   ;;  %vm1589_vm4 = vcmask 195584  }
  0x5f   :  { %4445 = vmatprep.subr.bf16.mxu0 %v4444_v10  ;;  %4189 = vmatprep.mubr.msk.f32.mxu0 %vm103_vm0, %v4931_v13  ;;  %vm3917_vm5 = vcmask 1041409   ;;  %vm3960_vm6 = vcmask 523264   ;;  %vm3962_vm7 = vcmask 785408  }
  0x60   :  { %v196_v14 = vrot.slane %v4929_v12, %v4913_v2  ;;  %v188_v24 = vrot.slane %v4929_v12, %v4955_v23  ;;  %v206_v37 = vrot.slane %v4929_v12, %v4980_v35 }
  0x62   :  { %198 = vrot.lane.b32.xlu0 %v196_v14, %s4800_s4  ;;  %4447 = vmatpush3.bf16.msra.mxu0 %v4444_v10 }
  0x63   :  { %4202 = vmatprep.subr.mxu0 %v4801_v19 }
  0x65   :  { %4190 = vmatmul.mubr.msk.f32.vlgmr.msra.gmra.mrb[0].mxu0 %vm103_vm0, %v4938_v16 }
  0x66   :  { %4204 = vmatprep.mubr.msk.f32.mxu0 %vm4803_vm1, %v4801_v19 }
  0xd4   :  { %v199_v17 = vpop.permute.xlu0 %198 }
 0x138   :  { %v4942_v18 = vpop.f32.mrb[0].mxu0 }
 0x139   :  { %v202_v20 = vadd.f32 %v4942_v18, %v199_v17  ;;  %v4947_v21 = vpop.f32.mrb[1].mxu0  ;;  %v190_v26 = vadd.f32 %v4942_v18, %v188_v24 }
 0x13a   :  { %v201_v22 = vadd.f32 %v199_v17, %v4947_v21  ;;  %v189_v25 = vadd.f32 %v188_v24, %v4947_v21 }
 0x13b   :  { %231 = vrot.lane.b32.xlu1 %v202_v20, %s4802_s16  ;;  %v192_v28 = vmul.f32 0.35355338, %v190_v26 }
 0x13c   :  { %229 = vrot.lane.b32.xlu0 %v201_v22, %s4802_s16  ;;  %v191_v27 = vmul.f32 0.35355338, %v189_v25 }
 0x13f   :  { %233 = vrot.lane.b32.xlu1 %v201_v22, %s4804_s28 }
 0x140   :  { %235 = vrot.lane.b32.xlu0 %v202_v20, %s4804_s28 }
 0x143   :  { %237 = vrot.lane.b32.xlu1 %v201_v22, %s4805_s29 }
 0x144   :  { %239 = vrot.lane.b32.xlu0 %v202_v20, %s4805_s29 }
 0x147   :  { %255 = vrot.lane.b32.xlu1 %v201_v22, %s4806_s30 }
 0x148   :  { %332 = vrot.lane.b32.xlu0 %v202_v20, %s4806_s30 }
 0x14b   :  { %215 = vrot.lane.b32.xlu1 %v191_v27, %s4802_s16 }
 0x14c   :  { %217 = vrot.lane.b32.xlu0 %v192_v28, %s4802_s16 }
 0x14f   :  { %219 = vrot.lane.b32.xlu1 %v191_v27, %s4804_s28 }
 0x150   :  { %221 = vrot.lane.b32.xlu0 %v192_v28, %s4804_s28 }
 0x1ad   :  { %v232_v29 = vpop.permute.xlu1 %231 }
 0x1ae   :  { %v230_v30 = vpop.permute.xlu0 %229  ;;  %484 = vrot.lane.b32.xlu0 %v232_v29, %s4806_s30 }
 0x1af   :  { %408 = vrot.lane.b32.xlu1 %v230_v30, %s4806_s30 }
 0x1b1   :  { %v234_v31 = vpop.permute.xlu1 %233 }
 0x1b2   :  { %v236_v32 = vpop.permute.xlu0 %235 }
 0x1b3   :  { %636 = vrot.lane.b32.xlu0 %v236_v32, %s4806_s30  ;;  %560 = vrot.lane.b32.xlu1 %v234_v31, %s4806_s30 }
 0x1b5   :  { %v238_v33 = vpop.permute.xlu1 %237 }
 0x1b6   :  { %v240_v34 = vpop.permute.xlu0 %239 }
 0x1b7   :  { %788 = vrot.lane.b32.xlu0 %v240_v34, %s4806_s30  ;;  %712 = vrot.lane.b32.xlu1 %v238_v33, %s4806_s30 }
 0x1b9   :  { %v256_v36 = vpop.permute.xlu1 %255 }
 0x1ba   :  { %4193 = vmatpush3.xpose.msk.msra.mxu1 %vm257_vm2, %v256_v36  ;;  %v333_v38 = vpop.permute.xlu0 %332 }
 0x1bb   :  { %225 = vrot.lane.b32.xlu0 %v192_v28, %s4805_s29  ;;  %223 = vrot.lane.b32.xlu1 %v191_v27, %s4805_s29 }
 0x1bc   :  { %4197 = vmatprep.subr.mxu1 %v4801_v19 }
 0x1bd   :  { %4195 = vmatmul.mubr.msk.f32.vlgmr.msra.gmra.mrb[0].mxu1 %vm257_vm2, %v191_v27  ;;  %v216_v40 = vpop.permute.xlu1 %215 }
 0x1be   :  { %4198 = vmatpush3.xpose.msk.msra.mxu1 %vm257_vm2, %v333_v38  ;;  %4199 = vmatprep.mubr.msk.f32.mxu1 %vm4803_vm1, %v4801_v19  ;;  %v218_v39 = vpop.permute.xlu0 %217 }
 0x1bf   :  { %208 = vrot.lane.b32.xlu1 %v206_v37, %s4807_s6  ;;  %4207 = vmatprep.subr.mxu1 %v4801_v19 }
 0x1c1   :  { %4200 = vmatmul.mubr.msk.f32.vlgmr.msra.gmra.mrb[2].mxu1 %vm257_vm2, %v192_v28  ;;  %v220_v42 = vpop.permute.xlu1 %219 }
 0x1c2   :  { %4209 = vmatprep.mubr.msk.f32.mxu1 %vm4803_vm1, %v4801_v19  ;;  %v222_v41 = vpop.permute.xlu0 %221 }
 0x220   :  { %v485_v43 = vpop.permute.xlu0 %484 }
 0x221   :  { %v409_v44 = vpop.permute.xlu1 %408  ;;  %4208 = vmatpush3.xpose.msk.msra.mxu1 %vm257_vm2, %v485_v43 }
 0x222   :  { %4203 = vmatpush3.xpose.msk.msra.mxu0 %vm257_vm2, %v409_v44  ;;  %4217 = vmatprep.subr.mxu1 %v4801_v19 }
 0x223   :  { %4212 = vmatprep.subr.mxu0 %v4801_v19 }
 0x224   :  { %4210 = vmatmul.mubr.msk.f32.vlgmr.msra.gmra.mrb[4].mxu1 %vm257_vm2, %v218_v39 }
 0x225   :  { %v637_v45 = vpop.permute.xlu0 %636  ;;  %4205 = vmatmul.mubr.msk.f32.vlgmr.msra.gmra.mrb[2].mxu0 %vm257_vm2, %v216_v40  ;;  %v561_v46 = vpop.permute.xlu1 %560  ;;  %4219 = vmatprep.mubr.msk.f32.mxu1 %vm4803_vm1, %v4801_v19 }
 0x226   :  { %4213 = vmatpush3.xpose.msk.msra.mxu0 %vm257_vm2, %v561_v46  ;;  %4218 = vmatpush3.xpose.msk.msra.mxu1 %vm257_vm2, %v637_v45 }
 0x227   :  { %4214 = vmatprep.mubr.msk.f32.mxu0 %vm4803_vm1, %v4801_v19  ;;  %4222 = vmatprep.subr.mxu0 %v4801_v19 }
 0x228   :  { %4227 = vmatprep.subr.mxu1 %v4801_v19 }
 0x229   :  { %v789_v47 = vpop.permute.xlu0 %788  ;;  %4215 = vmatmul.mubr.msk.f32.vlgmr.msra.gmra.mrb[4].mxu0 %vm257_vm2, %v220_v42  ;;  %v713_v48 = vpop.permute.xlu1 %712  ;;  %4220 = vmatmul.mubr.msk.f32.vlgmr.msra.gmra.mrb[6].mxu1 %vm257_vm2, %v222_v41 }
 0x22a   :  { %4223 = vmatpush3.xpose.msk.msra.mxu0 %vm257_vm2, %v713_v48  ;;  %4228 = vmatpush3.xpose.msk.msra.mxu1 %vm257_vm2, %v789_v47 }
 0x22b   :  { %4224 = vmatprep.mubr.msk.f32.mxu0 %vm4803_vm1, %v4801_v19  ;;  %4229 = vmatprep.mubr.msk.f32.mxu1 %vm4803_vm1, %v4801_v19 }
 0x22c   :  { %4237 = vmatprep.subr.mxu1 %v4801_v19  ;;  %4232 = vmatprep.subr.mxu0 %v4801_v19 }
 0x22d   :  { %v226_v49 = vpop.permute.xlu0 %225  ;;  %v224_v50 = vpop.permute.xlu1 %223 }
 0x22e   :  { %4225 = vmatmul.mubr.msk.f32.vlgmr.msra.gmra.mrb[6].mxu0 %vm257_vm2, %v224_v50  ;;  %4230 = vmatmul.mubr.msk.f32.vlgmr.msra.gmra.mrb[8].mxu1 %vm257_vm2, %v226_v49 }
 0x22f   :  { %4234 = vmatprep.mubr.msk.f32.mxu0 %vm4803_vm1, %v4801_v19  ;;  %4239 = vmatprep.mubr.msk.f32.mxu1 %vm4803_vm1, %v4801_v19 }
 0x231   :  { %v209_v24 = vpop.permute.xlu1 %208 }
 0x232   :  { %v211_v25 = vadd.f32 %v209_v24, %v4947_v21  ;;  %v212_v26 = vadd.f32 %v4942_v18, %v209_v24 }
 0x290   :  { %v328_v51 = vpop.f32.mrb[0].mxu1 }
 0x291   :  { %v4196_v52 = vpop.f32.mrb[1].mxu1  ;;  %v864_v53 = vsel %vm257_vm2, %v328_v51, -inf }
 0x292   :  { %865 = vmax.xlane.f32.xlu0 %v864_v53 }
 0x294   :  { %v5028_v54 = vpop.f32.mrb[2].mxu1 }
 0x295   :  { %v4201_v55 = vpop.f32.mrb[3].mxu1  ;;  %v867_v56 = vsel %vm257_vm2, %v5028_v54, -inf }
 0x296   :  { %868 = vmax.xlane.f32.xlu1 %v867_v56 }
 0x2f7   :  { %v556_v57 = vpop.f32.mrb[4].mxu1 }
 0x2f8   :  { %v480_v58 = vpop.f32.mrb[2].mxu0  ;;  %v4211_v59 = vpop.f32.mrb[5].mxu1  ;;  %v873_v10 = vsel %vm257_vm2, %v556_v57, -inf }
 0x2f9   :  { %v4206_v60 = vpop.f32.mrb[3].mxu0  ;;  %v870_v61 = vsel %vm257_vm2, %v480_v58, -inf }
 0x2fa   :  { %871 = vmax.xlane.f32.xlu0 %v870_v61 }
 0x2fc   :  { %v5033_v62 = vpop.f32.mrb[4].mxu0  ;;  %v708_v63 = vpop.f32.mrb[6].mxu1 }
 0x2fd   :  { %v4216_v0 = vpop.f32.mrb[5].mxu0  ;;  %v4221_v7 = vpop.f32.mrb[7].mxu1  ;;  %v876_v9 = vsel %vm257_vm2, %v5033_v62, -inf  ;;  %v879_v15 = vsel %vm257_vm2, %v708_v63, -inf }
 0x2fe   :  { %877 = vmax.xlane.f32.xlu1 %v876_v9  ;;  %874 = vmax.xlane.f32.xlu0 %v873_v10 }
 0x301   :  { %v5038_v11 = vpop.f32.mrb[6].mxu0  ;;  %v860_v14 = vpop.f32.mrb[8].mxu1 }
 0x302   :  { %v4226_v17 = vpop.f32.mrb[7].mxu0  ;;  %880 = vmax.xlane.f32.xlu0 %v879_v15  ;;  %v4231_v20 = vpop.f32.mrb[9].mxu1  ;;  %v885_v22 = vsel %vm257_vm2, %v860_v14, -inf  ;;  %v882_v27 = vsel %vm257_vm2, %v5038_v11, -inf }
 0x306   :  { %886 = vmax.xlane.f32.xlu0 %v885_v22 }
 0x30f   :  { %243 = vrot.lane.b32.xlu1 %v211_v25, %s4802_s16 }
 0x313   :  { %247 = vrot.lane.b32.xlu1 %v211_v25, %s4804_s28 }
 0x31c   :  { %245 = vrot.lane.b32.xlu0 %v212_v26, %s4802_s16 }
 0x31f   :  { %v866_v21 = vpop.xlane.xlu0 %865 }
 0x320   :  { %251 = vrot.lane.b32.xlu0 %v211_v25, %s4805_s29  ;;  %v888_v38 = vsub.f32 %v328_v51, %v866_v21 }
 0x322   :  { %v896_v40 = vmul.f32 1.442695, %v888_v38 }
 0x323   :  { %v869_v28 = vpop.xlane.xlu1 %868 }
 0x324   :  { %1028 = vrot.lane.b32.xlu0 %v212_v26, %s4807_s6  ;;  %4571 = vpow2.f32 %v896_v40  ;;  %v889_v7 = vsub.f32 %v5028_v54, %v869_v28 }
 0x326   :  { %v898_v9 = vmul.f32 1.442695, %v889_v7 }
 0x32e   :  { %v4572_v48 = vpop.eup %4571 }
 0x32f   :  { %v912_v50 = vsel %vm257_vm2, %v4572_v48, 0.0 }
 0x337   :  { %883 = vmax.xlane.f32.xlu1 %v882_v27 }
 0x348   :  { %249 = vrot.lane.b32.xlu1 %v212_v26, %s4804_s28 }
 0x34c   :  { %253 = vrot.lane.b32.xlu1 %v212_v26, %s4805_s29 }
 0x350   :  { %952 = vrot.lane.b32.xlu1 %v211_v25, %s4807_s6 }
 0x387   :  { %v872_v29 = vpop.xlane.xlu0 %871 }
 0x388   :  { %v890_v42 = vsub.f32 %v480_v58, %v872_v29 }
 0x38a   :  { %v900_v44 = vmul.f32 1.442695, %v890_v42 }
 0x38b   :  { %v878_v18 = vpop.xlane.xlu1 %877  ;;  %v875_v30 = vpop.xlane.xlu0 %874 }
 0x38c   :  { %v891_v41 = vsub.f32 %v556_v57, %v875_v30  ;;  %v892_v10 = vsub.f32 %v5033_v62, %v878_v18 }
 0x38e   :  { %v902_v43 = vmul.f32 1.442695, %v891_v41 }
 0x38f   :  { %v244_v31 = vpop.permute.xlu1 %243  ;;  %v881_v32 = vpop.xlane.xlu0 %880 }
 0x390   :  { %1104 = vrot.lane.b32.xlu1 %v244_v31, %s4807_s6  ;;  %4573 = vpow2.f32 %v902_v43  ;;  %v893_v45 = vsub.f32 %v708_v63, %v881_v32 }
 0x391   :  { %4575 = vpow2.f32 %v900_v44 }
 0x392   :  { %v906_v46 = vmul.f32 1.442695, %v893_v45 }
 0x393   :  { %v248_v33 = vpop.permute.xlu1 %247  ;;  %v887_v34 = vpop.xlane.xlu0 %886 }
 0x394   :  { %1256 = vrot.lane.b32.xlu0 %v248_v33, %s4807_s6  ;;  %v895_v47 = vsub.f32 %v860_v14, %v887_v34  ;;  %4577 = vpow2.f32 %v906_v46  ;;  %v904_v14 = vmul.f32 1.442695, %v892_v10 }
 0x396   :  { %v910_v49 = vmul.f32 1.442695, %v895_v47 }
 0x397   :  { %v246_v36 = vpop.permute.xlu0 %245 }
 0x398   :  { %1180 = vrot.lane.b32.xlu1 %v246_v36, %s4807_s6  ;;  %4579 = vpow2.f32 %v910_v49 }
 0x399   :  { %4581 = vpow2.f32 %v898_v9 }
 0x39a   :  { %v5059_v51 = vpop.eup %4573  ;;  %4583 = vpow2.f32 %v904_v14 }
 0x39b   :  { %v252_v37 = vpop.permute.xlu0 %251  ;;  %v921_v52 = vsel %vm257_vm2, %v5059_v51, 0.0  ;;  %v4576_v53 = vpop.eup %4575 }
 0x39c   :  { %v918_v55 = vsel %vm257_vm2, %v4576_v53, 0.0 }
 0x39e   :  { %v5064_v56 = vpop.eup %4577 }
 0x39f   :  { %v1029_v39 = vpop.permute.xlu0 %1028  ;;  %v927_v57 = vsel %vm257_vm2, %v5064_v56, 0.0 }
 0x3a0   :  { %4238 = vmatpush3.msra.mxu1 %v1029_v39 }
 0x3a1   :  { %4247 = vmatprep.subr.mxu1 %v4801_v19 }
 0x3a2   :  { %v5068_v58 = vpop.eup %4579 }
 0x3a3   :  { %v933_v59 = vsel %vm257_vm2, %v5068_v58, 0.0  ;;  %v4582_v20 = vpop.eup %4581 }
 0x3a4   :  { %v915_v54 = vsel %vm257_vm2, %v4582_v20, 0.0  ;;  %v4584_v22 = vpop.eup %4583 }
 0x3a5   :  { %v924_v24 = vsel %vm257_vm2, %v4584_v22, 0.0 }
 0x3b3   :  { %913 = vadd.xlane.f32.xlu0 %v912_v50 }
 0x3b7   :  { %922 = vadd.xlane.f32.xlu0 %v921_v52 }
 0x3bb   :  { %919 = vadd.xlane.f32.xlu0 %v918_v55 }
 0x3bf   :  { %928 = vadd.xlane.f32.xlu0 %v927_v57 }
 0x3c3   :  { %934 = vadd.xlane.f32.xlu0 %v933_v59 }
 0x3c4   :  { %v884_v60 = vpop.xlane.xlu1 %883 }
 0x3c5   :  { %v894_v15 = vsub.f32 %v5038_v11, %v884_v60 }
 0x3c7   :  { %v908_v17 = vmul.f32 1.442695, %v894_v15 }
 0x3c8   :  { %v250_v61 = vpop.permute.xlu1 %249 }
 0x3c9   :  { %1332 = vrot.lane.b32.xlu1 %v250_v61, %s4807_s6  ;;  %4585 = vpow2.f32 %v908_v17 }
 0x3cc   :  { %v254_v63 = vpop.permute.xlu1 %253 }
 0x3d0   :  { %v953_v0 = vpop.permute.xlu1 %952 }
 0x3d1   :  { %4233 = vmatpush3.msra.mxu0 %v953_v0 }
 0x3d2   :  { %4242 = vmatprep.subr.mxu0 %v4801_v19 }
 0x3d3   :  { %v4586_v62 = vpop.eup %4585 }
 0x3d4   :  { %v930_v25 = vsel %vm257_vm2, %v4586_v62, 0.0 }
 0x3d9   :  { %1408 = vrot.lane.b32.xlu0 %v252_v37, %s4807_s6 }
 0x3dd   :  { %4532 = vrot.lane.b32.xlu0 %v4531_v6, %s4800_s4 }
 0x3ed   :  { %916 = vadd.xlane.f32.xlu1 %v915_v54 }
 0x3f1   :  { %925 = vadd.xlane.f32.xlu1 %v924_v24 }
 0x3f5   :  { %931 = vadd.xlane.f32.xlu1 %v930_v25 }
 0x402   :  { %v1105_v21 = vpop.permute.xlu1 %1104 }
 0x406   :  { %1484 = vrot.lane.b32.xlu1 %v254_v63, %s4807_s6  ;;  %v1257_v3 = vpop.permute.xlu0 %1256 }
 0x40a   :  { %v1181_v18 = vpop.permute.xlu1 %1180 }
 0x43b   :  { %v1333_v30 = vpop.permute.xlu1 %1332 }
 0x440   :  { %v914_v4 = vpop.xlane.xlu0 %913 }
 0x441   :  { %4587 = vrcp.f32 %v914_v4 }
 0x444   :  { %v923_v6 = vpop.xlane.xlu0 %922 }
 0x448   :  { %v920_v11 = vpop.xlane.xlu0 %919 }
 0x449   :  { %4589 = vrcp.f32 %v920_v11 }
 0x44b   :  { %v4588_v26 = vpop.eup %4587 }
 0x44c   :  { %v937_v27 = vmul.f32 %v4588_v26, %v4572_v48  ;;  %v929_v32 = vpop.xlane.xlu0 %928 }
 0x44e   :  { %4235 = vmatmul.mubr.msk.f32.vlgmr.msra.gmra.mrb[8].mxu0 %vm257_vm2, %v937_v27 }
 0x44f   :  { %4243 = vmatpush3.msra.mxu0 %v1105_v21  ;;  %4244 = vmatprep.mubr.msk.f32.mxu0 %vm4803_vm1, %v4801_v19 }
 0x450   :  { %4252 = vmatprep.subr.mxu0 %v4801_v19  ;;  %v935_v34 = vpop.xlane.xlu0 %934 }
 0x453   :  { %v4590_v28 = vpop.eup %4589 }
 0x454   :  { %v941_v29 = vmul.f32 %v4590_v28, %v4576_v53  ;;  %v1409_v44 = vpop.permute.xlu0 %1408 }
 0x456   :  { %4245 = vmatmul.mubr.msk.f32.vlgmr.msra.gmra.mrb[10].mxu0 %vm257_vm2, %v941_v29 }
 0x457   :  { %4253 = vmatpush3.msra.mxu0 %v1257_v3  ;;  %4254 = vmatprep.mubr.msk.f32.mxu0 %vm4803_vm1, %v4801_v19 }
 0x458   :  { %4262 = vmatprep.subr.mxu0 %v4801_v19  ;;  %v4533_v52 = vpop.permute.xlu0 %4532 }
 0x459   :  { %v4535_v53 = vunpack.i.h.bf16 %v4533_v52  ;;  %v4534_v55 = vunpack.i.l.bf16 %v4533_v52 }
 0x47a   :  { %v917_v31 = vpop.xlane.xlu1 %916 }
 0x47b   :  { %4591 = vrcp.f32 %v917_v31  ;;  %v5131_v31 = vsub.s32 3, %v4910_v1 }
 0x47c   :  { %4593 = vrcp.f32 %v923_v6 }
 0x47e   :  { %v926_v33 = vpop.xlane.xlu1 %925 }
 0x47f   :  { %4595 = vrcp.f32 %v926_v33 }
 0x480   :  { %4597 = vrcp.f32 %v929_v32  ;;  %v1595_v32 = vrot.slane %v4929_v12, %v5131_v31 }
 0x482   :  { %v932_v36 = vpop.xlane.xlu1 %931 }
 0x483   :  { %4599 = vrcp.f32 %v932_v36 }
 0x484   :  { %4601 = vrcp.f32 %v935_v34 }
 0x485   :  { %v4592_v37 = vpop.eup %4591 }
 0x486   :  { %v939_v38 = vmul.f32 %v4592_v37, %v4582_v20  ;;  %v4594_v39 = vpop.eup %4593  ;;  %v1485_v49 = vpop.permute.xlu1 %1484 }
 0x487   :  { %v943_v41 = vmul.f32 %v4594_v39, %v5059_v51  ;;  %v4536_v51 = vpack.i.bf16 %v4925_v8, %v4919_v5 }
 0x488   :  { %4240 = vmatmul.mubr.msk.f32.vlgmr.msra.gmra.mrb[10].mxu1 %vm257_vm2, %v939_v38 }
 0x489   :  { %v4596_v40 = vpop.eup %4595  ;;  %4248 = vmatpush3.msra.mxu1 %v1181_v18  ;;  %4249 = vmatprep.mubr.msk.f32.mxu1 %vm4803_vm1, %v4801_v19 }
 0x48a   :  { %4257 = vmatprep.subr.mxu1 %v4801_v19  ;;  %v945_v42 = vmul.f32 %v4596_v40, %v4584_v22  ;;  %v4598_v43 = vpop.eup %4597  ;;  %4537 = vrot.lane.b32.xlu1 %v4536_v51, %s4800_s4  ;;  %v98_v51 = vld [vmem:[#allocation7 + $0x18] sm:$0xff] }
 0x48b   :  { %v947_v47 = vmul.f32 %v4598_v43, %v5064_v56  ;;  %v4448_v56 = vpack.c.bf16 %v4535_v53, %v4534_v55  ;;  %v100_v53 = vld [vmem:[#allocation7 + $0x28] sm:$0xff]  ;;  %v102_v55 = vld [vmem:[#allocation7 + $0x38] sm:$0xff] }
 0x48c   :  { %4250 = vmatmul.mubr.msk.f32.vlgmr.msra.gmra.mrb[12].mxu1 %vm257_vm2, %v943_v41  ;;  %4255 = vmatmul.mubr.msk.f32.vlgmr.msra.gmra.mrb[12].mxu0 %vm257_vm2, %v945_v42 }
 0x48d   :  { %v4600_v45 = vpop.eup %4599  ;;  %4258 = vmatpush3.msra.mxu1 %v1333_v30  ;;  %4263 = vmatpush3.msra.mxu0 %v1409_v44 }
 0x48e   :  { %v949_v46 = vmul.f32 %v4600_v45, %v4586_v62  ;;  %4259 = vmatprep.mubr.msk.f32.mxu1 %vm4803_vm1, %v4801_v19  ;;  %4264 = vmatprep.mubr.msk.f32.mxu0 %vm4803_vm1, %v4801_v19  ;;  %v4602_v48 = vpop.eup %4601 }
 0x48f   :  { %4267 = vmatprep.subr.mxu1 %v4801_v19  ;;  %v951_v50 = vmul.f32 %v4602_v48, %v5068_v58  ;;  %4449 = vmatprep.subr.bf16.mxu0 %v4448_v56 }
 0x490   :  { %4260 = vmatmul.mubr.msk.f32.vlgmr.msra.gmra.mrb[14].mxu1 %vm257_vm2, %v947_v47  ;;  %4265 = vmatmul.mubr.msk.f32.vlgmr.msra.gmra.mrb[14].mxu0 %vm257_vm2, %v949_v46 }
 0x491   :  { %4268 = vmatpush3.msra.mxu1 %v1485_v49  ;;  %4269 = vmatprep.mubr.msk.f32.mxu1 %vm4803_vm1, %v4801_v19 }
 0x492   :  { %4451 = vmatpush3.bf16.msra.mxu0 %v4448_v56  ;;  %v4460_v56 = vpack.c.bf16 %v102_v55, %v100_v53 }
 0x494   :  { %4270 = vmatmul.mubr.msk.f32.vlgmr.msra.gmra.mrb[16].mxu1 %vm257_vm2, %v951_v50 }
 0x4fc   :  { %v4538_v57 = vpop.permute.xlu1 %4537 }
 0x4fd   :  { %v4540_v59 = vunpack.i.h.bf16 %v4538_v57  ;;  %v4539_v60 = vunpack.i.l.bf16 %v4538_v57 }
 0x4ff   :  { %v4452_v63 = vpack.c.bf16 %v4540_v59, %v4539_v60  ;;  %v4546_v59 = vpack.i.bf16 %v102_v55, %v100_v53  ;;  %v5171_v55 = vld [vmem:[#allocation7 + $0x40] sm:$0xff] }
 0x501   :  { %4453 = vmatprep.subr.bf16.mxu0 %v4452_v63 }
 0x502   :  { %4455 = vmatpush3.bf16.msra.mxu0 %v4452_v63 }
 0x521   :  { %v1024_v61 = vpop.f32.mrb[8].mxu0 }
 0x522   :  { %v4236_v0 = vpop.f32.mrb[9].mxu0 }
 0x529   :  { %v1176_v58 = vpop.f32.mrb[10].mxu0 }
 0x52a   :  { %1562 = vrot.lane.b32.xlu0 %v1176_v58, %s4795_s17  ;;  %v4246_v5 = vpop.f32.mrb[11].mxu0 }
 0x55b   :  { %v1100_v8 = vpop.f32.mrb[10].mxu1 }
 0x55c   :  { %v4241_v7 = vpop.f32.mrb[11].mxu1 }
 0x55d   :  { %v1730_v7 = vsub.s32 5, %v4910_v1 }
 0x55f   :  { %v1252_v9 = vpop.f32.mrb[12].mxu1  ;;  %v1328_v10 = vpop.f32.mrb[12].mxu0 }
 0x560   :  { %1570 = vrot.lane.b32.xlu0 %v1328_v10, %s4798_s8  ;;  %v4256_v14 = vpop.f32.mrb[13].mxu0  ;;  %1564 = vrot.lane.b32.xlu1 %v1252_v9, %s4795_s17  ;;  %v4251_v15 = vpop.f32.mrb[13].mxu1 }
 0x563   :  { %v1404_v17 = vpop.f32.mrb[14].mxu1  ;;  %v1480_v20 = vpop.f32.mrb[14].mxu0 }
 0x564   :  { %1578 = vrot.lane.b32.xlu0 %v1480_v20, %s4808_s7  ;;  %v4266_v54 = vpop.f32.mrb[15].mxu0  ;;  %1572 = vrot.lane.b32.xlu1 %v1404_v17, %s4798_s8  ;;  %v4261_v22 = vpop.f32.mrb[15].mxu1 }
 0x567   :  { %v1556_v24 = vpop.f32.mrb[16].mxu1 }
 0x568   :  { %1580 = vrot.lane.b32.xlu1 %v1556_v24, %s4808_s7  ;;  %v4271_v62 = vpop.f32.mrb[17].mxu1 }
 0x569   :  { %v1731_v62 = vrot.slane %v4929_v12, %v1730_v7 }
 0x59c   :  { %v1563_v25 = vpop.permute.xlu0 %1562 }
 0x59d   :  { %v1584_v6 = vsel %vm257_vm2, %v1024_v61, %v1563_v25 }
 0x5d2   :  { %v1571_v3 = vpop.permute.xlu0 %1570  ;;  %v1565_v4 = vpop.permute.xlu1 %1564 }
 0x5d3   :  { %v1587_v11 = vsel %vm1586_vm3, %v1584_v6, %v1571_v3  ;;  %v1585_v28 = vsel %vm257_vm2, %v1100_v8, %v1565_v4  ;;  %v5144_v8 = vsub.s32 4, %v4910_v1 }
 0x5d5   :  { %v1725_v9 = vrot.slane %v4929_v12, %v5144_v8 }
 0x5d6   :  { %v1579_v26 = vpop.permute.xlu0 %1578  ;;  %v1573_v27 = vpop.permute.xlu1 %1572 }
 0x5d7   :  { %v1590_v21 = vsel %vm1589_vm4, %v1587_v11, %v1579_v26  ;;  %v1588_v29 = vsel %vm1586_vm3, %v1585_v28, %v1573_v27  ;;  %v1736_v28 = vsub.s32 6, %v4910_v1 }
 0x5d8   :  { %4280 = vmatprep.mubr.msk.f32.mxu0 %vm103_vm0, %v1590_v21 }
 0x5da   :  { %v1581_v18 = vpop.permute.xlu1 %1580 }
 0x5db   :  { %v1591_v30 = vsel %vm1589_vm4, %v1588_v29, %v1581_v18  ;;  %v1737_v29 = vrot.slane %v4929_v12, %v1736_v28 }
 0x5dc   :  { %4281 = vmatmul.mubr.msk.f32.vlgmr.msra.gmra.mrb[16].mxu0 %vm103_vm0, %v1591_v30 }
 0x6af   :  { %v4282_v33 = vpop.f32.mrb[16].mxu0 }
 0x6b0   :  { %v1690_v34 = vadd.f32 %v4282_v33, %v1595_v32  ;;  %v1684_v36 = vpop.f32.mrb[17].mxu0 }
 0x6b1   :  { %v1685_v37 = vadd.f32 %v1684_v36, %v1595_v32 }
 0x6b2   :  { %v1694_v38 = vadd.f32 %v1690_v34, %v4938_v16 }
 0x6b3   :  { %v1693_v39 = vadd.f32 %v1685_v37, %v4931_v13  ;;  %v96_v13 = vld [vmem:[#allocation7 + $0x8] sm:$0xff]  ;;  %v1823_v37 = vsub.s32 7, %v4910_v1 }
 0x6b4   :  { %v1698_v40 = vsel %vm103_vm0, %v1694_v38, 0.0  ;;  %v4456_v52 = vpack.c.bf16 %v98_v51, %v96_v13  ;;  %v4541_v57 = vpack.i.bf16 %v98_v51, %v96_v13 }
 0x6b5   :  { %1699 = vadd.xlane.f32.xlu1 %v1698_v40  ;;  %v1695_v41 = vsel %vm103_vm0, %v1693_v39, 0.0 }
 0x6b6   :  { %1696 = vadd.xlane.f32.xlu0 %v1695_v41  ;;  %4457 = vmatprep.subr.bf16.mxu1 %v4456_v52 }
 0x6b7   :  { %4459 = vmatpush3.bf16.msra.mxu1 %v4456_v52 }
 0x6b8   :  { %4461 = vmatprep.subr.bf16.mxu1 %v4460_v56 }
 0x6bb   :  { %4463 = vmatpush3.bf16.msra.mxu1 %v4460_v56  ;;  %v5173_v56 = vld [vmem:[#allocation7 + $0x50] sm:$0xff] }
 0x6c6   :  { %4542 = vrot.lane.b32.xlu1 %v4541_v57, %s4806_s30  ;;  %v4472_v57 = vpack.c.bf16 %v5173_v56, %v5171_v55 }
 0x6c8   :  { %4473 = vmatprep.subr.bf16.mxu1 %v4472_v57 }
 0x742   :  { %v1700_v42 = vpop.xlane.xlu1 %1699 }
 0x743   :  { %v1703_v43 = vmul.f32 0.03125, %v1700_v42  ;;  %v1697_v44 = vpop.xlane.xlu0 %1696 }
 0x744   :  { %v1702_v45 = vmul.f32 0.03125, %v1697_v44 }
 0x745   :  { %v1705_v46 = vsub.f32 %v1694_v38, %v1703_v43  ;;  %v1824_v38 = vrot.slane %v4929_v12, %v1823_v37 }
 0x746   :  { %v1704_v47 = vsub.f32 %v1693_v39, %v1702_v45  ;;  %v4543_v10 = vpop.permute.xlu1 %4542 }
 0x747   :  { %v1707_v50 = vmul.f32 %v1705_v46, %v1705_v46  ;;  %v4545_v17 = vunpack.i.h.bf16 %v4543_v10  ;;  %v4544_v20 = vunpack.i.l.bf16 %v4543_v10 }
 0x748   :  { %v1706_v48 = vmul.f32 %v1704_v47, %v1704_v47 }
 0x749   :  { %v1711_v16 = vsel %vm103_vm0, %v1707_v50, 0.0  ;;  %v4464_v25 = vpack.c.bf16 %v4545_v17, %v4544_v20 }
 0x74a   :  { %v1708_v49 = vsel %vm103_vm0, %v1706_v48, 0.0 }
 0x74b   :  { %1709 = vadd.xlane.f32.xlu0 %v1708_v49  ;;  %4465 = vmatprep.subr.bf16.mxu0 %v4464_v25 }
 0x74c   :  { %4467 = vmatpush3.bf16.msra.mxu0 %v4464_v25 }
 0x74f   :  { %1712 = vadd.xlane.f32.xlu0 %v1711_v16 }
 0x765   :  { %4547 = vrot.lane.b32.xlu0 %v4546_v59, %s4806_s30  ;;  %v4551_v59 = vpack.i.bf16 %v5173_v56, %v5171_v55 }
 0x7d8   :  { %v1710_v60 = vpop.xlane.xlu0 %1709 }
 0x7d9   :  { %v1714_v61 = vmul.f32 0.03125, %v1710_v60  ;;  %v5179_v60 = vld [vmem:[#allocation7 + $0x60] sm:$0xff] }
 0x7db   :  { %v1716_v63 = vadd.f32 1e-05, %v1714_v61  ;;  %v5181_v61 = vld [vmem:[#allocation7 + $0x70] sm:$0xff] }
 0x7dc   :  { %v1713_v0 = vpop.xlane.xlu0 %1712 }
 0x7dd   :  { %4603 = vrsqrt.f32 %v1716_v63  ;;  %v1715_v58 = vmul.f32 0.03125, %v1713_v0  ;;  %v4556_v63 = vpack.i.bf16 %v5181_v61, %v5179_v60  ;;  %v4476_v0 = vpack.c.bf16 %v5181_v61, %v5179_v60 }
 0x7df   :  { %v1717_v5 = vadd.f32 1e-05, %v1715_v58  ;;  %v5187_v58 = vld [vmem:[#allocation10 + $0x8] sm:$0xff] }
 0x7e0   :  { %v4548_v14 = vpop.permute.xlu0 %4547 }
 0x7e1   :  { %4605 = vrsqrt.f32 %v1717_v5  ;;  %v4550_v54 = vunpack.i.h.bf16 %v4548_v14  ;;  %v4549_v22 = vunpack.i.l.bf16 %v4548_v14  ;;  %v2063_v5 = vrot.slane %v5187_v58, %v5131_v31 }
 0x7e3   :  { %v4468_v3 = vpack.c.bf16 %v4550_v54, %v4549_v22  ;;  %v1953_v54 = vrot.slane %v5187_v58, %v4955_v23 }
 0x7e5   :  { %4469 = vmatprep.subr.bf16.mxu0 %v4468_v3 }
 0x7e6   :  { %4471 = vmatpush3.bf16.msra.mxu0 %v4468_v3  ;;  %v1959_v3 = vrot.slane %v5187_v58, %v4913_v2 }
 0x7e7   :  { %v4604_v15 = vpop.eup %4603  ;;  %4316 = vmatprep.subr.mxu0 %v4801_v19 }
 0x7e8   :  { %v1720_v24 = vmul.f32 %v4604_v15, %v1704_v47 }
 0x7ea   :  { %v1726_v4 = vmul.f32 %v1725_v9, %v1720_v24 }
 0x7eb   :  { %v4606_v6 = vpop.eup %4605 }
 0x7ec   :  { %v1721_v11 = vmul.f32 %v4606_v6, %v1705_v46  ;;  %v1732_v26 = vadd.f32 %v1731_v62, %v1726_v4 }
 0x7ee   :  { %v1727_v27 = vmul.f32 %v1725_v9, %v1721_v11  ;;  %4291 = vmatprep.mubr.msk.f32.mxu1 %vm103_vm0, %v1732_v26 }
 0x7f0   :  { %v1733_v21 = vadd.f32 %v1731_v62, %v1727_v27 }
 0x7f2   :  { %4292 = vmatmul.mubr.msk.f32.vlgmr.msra.gmra.mrb[18].mxu1 %vm103_vm0, %v1733_v21 }
 0x7f3   :  { %4475 = vmatpush3.bf16.msra.mxu1 %v4472_v57 }
 0x7f4   :  { %4477 = vmatprep.subr.bf16.mxu1 %v4476_v0 }
 0x7f7   :  { %4479 = vmatpush3.bf16.msra.mxu1 %v4476_v0 }
 0x7f8   :  { %4321 = vmatprep.subr.mxu1 %v4801_v19 }
 0x8c5   :  { %v4293_v18 = vpop.f32.mrb[18].mxu1 }
 0x8c6   :  { %v1816_v30 = vadd.f32 %v4293_v18, %v1737_v29  ;;  %v1810_v32 = vpop.f32.mrb[19].mxu1 }
 0x8c7   :  { %v1811_v33 = vadd.f32 %v1810_v32, %v1737_v29  ;;  %v2055_v32 = vrot.slane %v5187_v58, %v4980_v35 }
 0x8c8   :  { %v1820_v36 = vmax.f32 %v1816_v30, 0.0 }
 0x8c9   :  { %v1819_v34 = vmax.f32 %v1811_v33, 0.0 }
 0x8cb   :  { %4302 = vmatprep.mubr.msk.f32.mxu0 %vm103_vm0, %v1819_v34 }
 0x8cc   :  { %4303 = vmatmul.mubr.msk.f32.vlgmr.msra.gmra.mrb[18].mxu0 %vm103_vm0, %v1820_v36 }
 0x8cd   :  { %4318 = vmatprep.mubr.msk.f32.mxu0 %vm4803_vm1, %v4801_v19 }
 0x99f   :  { %v4304_v39 = vpop.f32.mrb[18].mxu0 }
 0x9a0   :  { %v1919_v40 = vadd.f32 %v4304_v39, %v1824_v38  ;;  %v1913_v41 = vpop.f32.mrb[19].mxu0 }
 0x9a1   :  { %v1914_v42 = vadd.f32 %v1913_v41, %v1824_v38 }
 0x9a2   :  { %v1923_v43 = vadd.f32 %v1919_v40, %v1733_v21 }
 0x9a3   :  { %v1922_v44 = vadd.f32 %v1914_v42, %v1732_v26 }
 0x9a4   :  { %v1927_v45 = vsel %vm103_vm0, %v1923_v43, 0.0 }
 0x9a5   :  { %1928 = vadd.xlane.f32.xlu0 %v1927_v45  ;;  %v1924_v46 = vsel %vm103_vm0, %v1922_v44, 0.0 }
 0x9a6   :  { %1925 = vadd.xlane.f32.xlu1 %v1924_v46 }
 0xa32   :  { %v1929_v47 = vpop.xlane.xlu0 %1928 }
 0xa33   :  { %v1931_v48 = vmul.f32 0.03125, %v1929_v47  ;;  %v1926_v49 = vpop.xlane.xlu1 %1925  ;;  %v2073_v47 = vrot.slane %v5187_v58, %v5144_v8 }
 0xa34   :  { %v1930_v50 = vmul.f32 0.03125, %v1926_v49 }
 0xa35   :  { %v1933_v16 = vsub.f32 %v1923_v43, %v1931_v48 }
 0xa36   :  { %v1932_v13 = vsub.f32 %v1922_v44, %v1930_v50 }
 0xa37   :  { %v1935_v51 = vmul.f32 %v1933_v16, %v1933_v16 }
 0xa38   :  { %v1934_v12 = vmul.f32 %v1932_v13, %v1932_v13 }
 0xa39   :  { %v1939_v52 = vsel %vm103_vm0, %v1935_v51, 0.0 }
 0xa3a   :  { %1940 = vadd.xlane.f32.xlu0 %v1939_v52  ;;  %v1936_v53 = vsel %vm103_vm0, %v1934_v12, 0.0 }
 0xa3b   :  { %1937 = vadd.xlane.f32.xlu1 %v1936_v53 }
 0xa4c   :  { %2065 = vrot.lane.b32.xlu1 %v2063_v5, %s4800_s4 }
 0xac7   :  { %v1941_v9 = vpop.xlane.xlu0 %1940 }
 0xac8   :  { %v1943_v10 = vmul.f32 0.03125, %v1941_v9  ;;  %v1938_v14 = vpop.xlane.xlu1 %1937 }
 0xac9   :  { %v1942_v15 = vmul.f32 0.03125, %v1938_v14 }
 0xaca   :  { %v1945_v17 = vadd.f32 1e-05, %v1943_v10 }
 0xacb   :  { %v1944_v20 = vadd.f32 1e-05, %v1942_v15 }
 0xacc   :  { %4607 = vrsqrt.f32 %v1945_v17  ;;  %v2066_v27 = vpop.permute.xlu1 %2065 }
 0xacd   :  { %4609 = vrsqrt.f32 %v1944_v20 }
 0xad6   :  { %v4608_v22 = vpop.eup %4607 }
 0xad7   :  { %v4610_v24 = vpop.eup %4609  ;;  %v1949_v62 = vmul.f32 %v4608_v22, %v1933_v16 }
 0xad8   :  { %v1948_v25 = vmul.f32 %v4610_v24, %v1932_v13 }
 0xad9   :  { %v1955_v4 = vmul.f32 %v1953_v54, %v1949_v62 }
 0xada   :  { %v1954_v6 = vmul.f32 %v1953_v54, %v1948_v25 }
 0xadb   :  { %v5199_v26 = vadd.f32 %v1959_v3, %v1955_v4 }
 0xadc   :  { %v5197_v11 = vadd.f32 %v1959_v3, %v1954_v6 }
 0xade   :  { %4313 = vmatprep.mubr.msk.f32.mxu1 %vm103_vm0, %v5197_v11 }
 0xadf   :  { %4314 = vmatmul.mubr.msk.f32.vlgmr.msra.gmra.mrb[20].mxu1 %vm103_vm0, %v5199_v26 }
 0xae0   :  { %4323 = vmatprep.mubr.msk.f32.mxu1 %vm4803_vm1, %v4801_v19 }
 0xbb2   :  { %v5207_v21 = vpop.f32.mrb[20].mxu1 }
 0xbb3   :  { %v2069_v29 = vadd.f32 %v5207_v21, %v2066_v27  ;;  %v5210_v18 = vpop.f32.mrb[21].mxu1  ;;  %v2057_v34 = vadd.f32 %v5207_v21, %v2055_v32 }
 0xbb4   :  { %v2068_v30 = vadd.f32 %v2066_v27, %v5210_v18  ;;  %v2056_v33 = vadd.f32 %v2055_v32, %v5210_v18 }
 0xbb5   :  { %2098 = vrot.lane.b32.xlu1 %v2069_v29, %s4802_s16  ;;  %v2059_v38 = vmul.f32 0.35355338, %v2057_v34 }
 0xbb6   :  { %2096 = vrot.lane.b32.xlu0 %v2068_v30, %s4802_s16  ;;  %v2058_v36 = vmul.f32 0.35355338, %v2056_v33 }
 0xbb9   :  { %2100 = vrot.lane.b32.xlu1 %v2068_v30, %s4804_s28 }
 0xbba   :  { %2102 = vrot.lane.b32.xlu0 %v2069_v29, %s4804_s28 }
 0xbbd   :  { %2104 = vrot.lane.b32.xlu1 %v2068_v30, %s4805_s29 }
 0xbbe   :  { %2106 = vrot.lane.b32.xlu0 %v2069_v29, %s4805_s29 }
 0xbc1   :  { %2122 = vrot.lane.b32.xlu1 %v2068_v30, %s4806_s30 }
 0xbc2   :  { %2198 = vrot.lane.b32.xlu0 %v2069_v29, %s4806_s30 }
 0xbc5   :  { %2082 = vrot.lane.b32.xlu1 %v2058_v36, %s4802_s16 }
 0xbc6   :  { %2084 = vrot.lane.b32.xlu0 %v2059_v38, %s4802_s16 }
 0xbc9   :  { %2086 = vrot.lane.b32.xlu1 %v2058_v36, %s4804_s28 }
 0xbca   :  { %2088 = vrot.lane.b32.xlu0 %v2059_v38, %s4804_s28 }
 0xc27   :  { %v2099_v39 = vpop.permute.xlu1 %2098 }
 0xc28   :  { %2350 = vrot.lane.b32.xlu0 %v2099_v39, %s4806_s30  ;;  %v2097_v40 = vpop.permute.xlu0 %2096 }
 0xc29   :  { %2274 = vrot.lane.b32.xlu1 %v2097_v40, %s4806_s30 }
 0xc2b   :  { %v2101_v41 = vpop.permute.xlu1 %2100 }
 0xc2c   :  { %v2103_v42 = vpop.permute.xlu0 %2102 }
 0xc2d   :  { %2426 = vrot.lane.b32.xlu1 %v2101_v41, %s4806_s30  ;;  %2502 = vrot.lane.b32.xlu0 %v2103_v42, %s4806_s30 }
 0xc2f   :  { %v2105_v43 = vpop.permute.xlu1 %2104 }
 0xc30   :  { %v2107_v44 = vpop.permute.xlu0 %2106 }
 0xc31   :  { %2578 = vrot.lane.b32.xlu1 %v2105_v43, %s4806_s30  ;;  %2654 = vrot.lane.b32.xlu0 %v2107_v44, %s4806_s30 }
 0xc33   :  { %v2123_v45 = vpop.permute.xlu1 %2122 }
 0xc34   :  { %4317 = vmatpush3.xpose.msk.msra.mxu0 %vm257_vm2, %v2123_v45  ;;  %v2199_v46 = vpop.permute.xlu0 %2198 }
 0xc35   :  { %2090 = vrot.lane.b32.xlu1 %v2058_v36, %s4805_s29  ;;  %2092 = vrot.lane.b32.xlu0 %v2059_v38, %s4805_s29 }
 0xc36   :  { %4322 = vmatpush3.xpose.msk.msra.mxu1 %vm257_vm2, %v2199_v46  ;;  %4326 = vmatprep.subr.mxu0 %v4801_v19 }
 0xc37   :  { %4319 = vmatmul.mubr.msk.f32.vlgmr.msra.gmra.mrb[20].mxu0 %vm257_vm2, %v2058_v36  ;;  %4331 = vmatprep.subr.mxu1 %v4801_v19  ;;  %v2083_v49 = vpop.permute.xlu1 %2082 }
 0xc38   :  { %4328 = vmatprep.mubr.msk.f32.mxu0 %vm4803_vm1, %v4801_v19  ;;  %v2085_v48 = vpop.permute.xlu0 %2084 }
 0xc39   :  { %4324 = vmatmul.mubr.msk.f32.vlgmr.msra.gmra.mrb[22].mxu1 %vm257_vm2, %v2059_v38  ;;  %2075 = vrot.lane.b32.xlu1 %v2073_v47, %s4807_s6 }
 0xc3a   :  { %4333 = vmatprep.mubr.msk.f32.mxu1 %vm4803_vm1, %v4801_v19 }
 0xc3b   :  { %v2087_v16 = vpop.permute.xlu1 %2086 }
 0xc3c   :  { %v2089_v50 = vpop.permute.xlu0 %2088 }
 0xc9a   :  { %v2351_v13 = vpop.permute.xlu0 %2350 }
 0xc9b   :  { %v2275_v51 = vpop.permute.xlu1 %2274  ;;  %4332 = vmatpush3.xpose.msk.msra.mxu1 %vm257_vm2, %v2351_v13 }
 0xc9c   :  { %4327 = vmatpush3.xpose.msk.msra.mxu0 %vm257_vm2, %v2275_v51  ;;  %4341 = vmatprep.subr.mxu1 %v4801_v19 }
 0xc9d   :  { %4336 = vmatprep.subr.mxu0 %v4801_v19 }
 0xc9e   :  { %4334 = vmatmul.mubr.msk.f32.vlgmr.msra.gmra.mrb[24].mxu1 %vm257_vm2, %v2085_v48 }
 0xc9f   :  { %4329 = vmatmul.mubr.msk.f32.vlgmr.msra.gmra.mrb[22].mxu0 %vm257_vm2, %v2083_v49  ;;  %v2427_v12 = vpop.permute.xlu1 %2426  ;;  %v2503_v52 = vpop.permute.xlu0 %2502  ;;  %4343 = vmatprep.mubr.msk.f32.mxu1 %vm4803_vm1, %v4801_v19 }
 0xca0   :  { %4337 = vmatpush3.xpose.msk.msra.mxu0 %vm257_vm2, %v2427_v12  ;;  %4342 = vmatpush3.xpose.msk.msra.mxu1 %vm257_vm2, %v2503_v52 }
 0xca1   :  { %4338 = vmatprep.mubr.msk.f32.mxu0 %vm4803_vm1, %v4801_v19  ;;  %4346 = vmatprep.subr.mxu0 %v4801_v19 }
 0xca2   :  { %4351 = vmatprep.subr.mxu1 %v4801_v19 }
 0xca3   :  { %4339 = vmatmul.mubr.msk.f32.vlgmr.msra.gmra.mrb[24].mxu0 %vm257_vm2, %v2087_v16  ;;  %v2579_v53 = vpop.permute.xlu1 %2578  ;;  %4344 = vmatmul.mubr.msk.f32.vlgmr.msra.gmra.mrb[26].mxu1 %vm257_vm2, %v2089_v50  ;;  %v2655_v57 = vpop.permute.xlu0 %2654 }
 0xca4   :  { %4347 = vmatpush3.xpose.msk.msra.mxu0 %vm257_vm2, %v2579_v53  ;;  %4352 = vmatpush3.xpose.msk.msra.mxu1 %vm257_vm2, %v2655_v57 }
 0xca5   :  { %4348 = vmatprep.mubr.msk.f32.mxu0 %vm4803_vm1, %v4801_v19  ;;  %4353 = vmatprep.mubr.msk.f32.mxu1 %vm4803_vm1, %v4801_v19 }
 0xca6   :  { %4361 = vmatprep.subr.mxu1 %v4801_v19  ;;  %4356 = vmatprep.subr.mxu0 %v4801_v19 }
 0xca7   :  { %v2091_v0 = vpop.permute.xlu1 %2090  ;;  %v2093_v5 = vpop.permute.xlu0 %2092 }
 0xca8   :  { %4349 = vmatmul.mubr.msk.f32.vlgmr.msra.gmra.mrb[26].mxu0 %vm257_vm2, %v2091_v0  ;;  %4354 = vmatmul.mubr.msk.f32.vlgmr.msra.gmra.mrb[28].mxu1 %vm257_vm2, %v2093_v5 }
 0xca9   :  { %4358 = vmatprep.mubr.msk.f32.mxu0 %vm4803_vm1, %v4801_v19  ;;  %4363 = vmatprep.mubr.msk.f32.mxu1 %vm4803_vm1, %v4801_v19 }
 0xcab   :  { %v2076_v40 = vpop.permute.xlu1 %2075 }
 0xcac   :  { %v2078_v41 = vadd.f32 %v2076_v40, %v5210_v18  ;;  %v2079_v42 = vadd.f32 %v5207_v21, %v2076_v40 }
 0xd0a   :  { %v2194_v9 = vpop.f32.mrb[20].mxu0 }
 0xd0b   :  { %v4320_v10 = vpop.f32.mrb[21].mxu0  ;;  %v2730_v14 = vsel %vm257_vm2, %v2194_v9, -inf }
 0xd0c   :  { %v5281_v15 = vpop.f32.mrb[22].mxu1  ;;  %2731 = vmax.xlane.f32.xlu0 %v2730_v14 }
 0xd0d   :  { %v4325_v17 = vpop.f32.mrb[23].mxu1  ;;  %v2733_v20 = vsel %vm257_vm2, %v5281_v15, -inf }
 0xd0e   :  { %2734 = vmax.xlane.f32.xlu1 %v2733_v20 }
 0xd71   :  { %v2422_v54 = vpop.f32.mrb[24].mxu1 }
 0xd72   :  { %v2346_v22 = vpop.f32.mrb[22].mxu0  ;;  %v4335_v24 = vpop.f32.mrb[25].mxu1  ;;  %v2739_v30 = vsel %vm257_vm2, %v2422_v54, -inf }
 0xd73   :  { %v4330_v62 = vpop.f32.mrb[23].mxu0  ;;  %v2736_v25 = vsel %vm257_vm2, %v2346_v22, -inf }
 0xd74   :  { %2737 = vmax.xlane.f32.xlu0 %v2736_v25 }
 0xd76   :  { %v5286_v3 = vpop.f32.mrb[24].mxu0  ;;  %v2574_v4 = vpop.f32.mrb[26].mxu1 }
 0xd77   :  { %v4340_v6 = vpop.f32.mrb[25].mxu0  ;;  %v4345_v27 = vpop.f32.mrb[27].mxu1  ;;  %v2742_v29 = vsel %vm257_vm2, %v5286_v3, -inf  ;;  %v2745_v34 = vsel %vm257_vm2, %v2574_v4, -inf }
 0xd78   :  { %2743 = vmax.xlane.f32.xlu1 %v2742_v29  ;;  %2740 = vmax.xlane.f32.xlu0 %v2739_v30 }
 0xd7b   :  { %v5291_v32 = vpop.f32.mrb[26].mxu0  ;;  %v2726_v33 = vpop.f32.mrb[28].mxu1 }
 0xd7c   :  { %v4350_v36 = vpop.f32.mrb[27].mxu0  ;;  %2746 = vmax.xlane.f32.xlu0 %v2745_v34  ;;  %v4355_v38 = vpop.f32.mrb[29].mxu1  ;;  %v2751_v39 = vsel %vm257_vm2, %v2726_v33, -inf  ;;  %v2748_v43 = vsel %vm257_vm2, %v5291_v32, -inf }
 0xd80   :  { %2752 = vmax.xlane.f32.xlu0 %v2751_v39 }
 0xd89   :  { %2110 = vrot.lane.b32.xlu1 %v2078_v41, %s4802_s16 }
 0xd8d   :  { %2114 = vrot.lane.b32.xlu1 %v2078_v41, %s4804_s28 }
 0xd96   :  { %2112 = vrot.lane.b32.xlu0 %v2079_v42, %s4802_s16 }
 0xd99   :  { %v2732_v18 = vpop.xlane.xlu0 %2731 }
 0xd9a   :  { %2118 = vrot.lane.b32.xlu0 %v2078_v41, %s4805_s29  ;;  %v2754_v12 = vsub.f32 %v2194_v9, %v2732_v18 }
 0xd9b   :  { %v2735_v44 = vpop.xlane.xlu1 %2734 }
 0xd9c   :  { %v2762_v53 = vmul.f32 1.442695, %v2754_v12  ;;  %v2755_v38 = vsub.f32 %v5281_v15, %v2735_v44 }
 0xd9e   :  { %2894 = vrot.lane.b32.xlu0 %v2079_v42, %s4807_s6  ;;  %4611 = vpow2.f32 %v2762_v53  ;;  %v2764_v39 = vmul.f32 1.442695, %v2755_v38 }
 0xda8   :  { %v4612_v24 = vpop.eup %4611 }
 0xda9   :  { %v2778_v9 = vsel %vm257_vm2, %v4612_v24, 0.0 }
 0xdb1   :  { %2749 = vmax.xlane.f32.xlu1 %v2748_v43 }
 0xdc2   :  { %2116 = vrot.lane.b32.xlu1 %v2079_v42, %s4804_s28 }
 0xdc6   :  { %2120 = vrot.lane.b32.xlu1 %v2079_v42, %s4805_s29 }
 0xdca   :  { %2818 = vrot.lane.b32.xlu1 %v2078_v41, %s4807_s6 }
 0xe01   :  { %v2738_v45 = vpop.xlane.xlu0 %2737 }
 0xe02   :  { %v2756_v0 = vsub.f32 %v2346_v22, %v2738_v45 }
 0xe04   :  { %v2766_v10 = vmul.f32 1.442695, %v2756_v0 }
 0xe05   :  { %v2744_v21 = vpop.xlane.xlu1 %2743  ;;  %v2741_v46 = vpop.xlane.xlu0 %2740 }
 0xe06   :  { %v2758_v47 = vsub.f32 %v5286_v3, %v2744_v21  ;;  %v2757_v57 = vsub.f32 %v2422_v54, %v2741_v46 }
 0xe08   :  { %v2768_v5 = vmul.f32 1.442695, %v2757_v57  ;;  %v2770_v40 = vmul.f32 1.442695, %v2758_v47 }
 0xe09   :  { %v2111_v48 = vpop.permute.xlu1 %2110  ;;  %v2747_v49 = vpop.xlane.xlu0 %2746 }
 0xe0a   :  { %2970 = vrot.lane.b32.xlu1 %v2111_v48, %s4807_s6  ;;  %4613 = vpow2.f32 %v2768_v5  ;;  %v2759_v14 = vsub.f32 %v2574_v4, %v2747_v49 }
 0xe0b   :  { %4615 = vpow2.f32 %v2766_v10 }
 0xe0c   :  { %v2772_v17 = vmul.f32 1.442695, %v2759_v14 }
 0xe0d   :  { %v2115_v50 = vpop.permute.xlu1 %2114  ;;  %v2753_v16 = vpop.xlane.xlu0 %2752 }
 0xe0e   :  { %3122 = vrot.lane.b32.xlu0 %v2115_v50, %s4807_s6  ;;  %v2761_v20 = vsub.f32 %v2726_v33, %v2753_v16  ;;  %4617 = vpow2.f32 %v2772_v17 }
 0xe10   :  { %v2776_v62 = vmul.f32 1.442695, %v2761_v20 }
 0xe11   :  { %v2113_v13 = vpop.permute.xlu0 %2112 }
 0xe12   :  { %3046 = vrot.lane.b32.xlu1 %v2113_v13, %s4807_s6  ;;  %4619 = vpow2.f32 %v2776_v62 }
 0xe13   :  { %4621 = vpow2.f32 %v2764_v39 }
 0xe14   :  { %v5313_v25 = vpop.eup %4613  ;;  %4623 = vpow2.f32 %v2770_v40 }
 0xe15   :  { %v2119_v51 = vpop.permute.xlu0 %2118  ;;  %v2787_v54 = vsel %vm257_vm2, %v5313_v25, 0.0  ;;  %v4616_v22 = vpop.eup %4615 }
 0xe16   :  { %v2784_v3 = vsel %vm257_vm2, %v4616_v22, 0.0 }
 0xe18   :  { %v5318_v4 = vpop.eup %4617 }
 0xe19   :  { %v2895_v52 = vpop.permute.xlu0 %2894  ;;  %v2793_v6 = vsel %vm257_vm2, %v5318_v4, 0.0 }
 0xe1a   :  { %4362 = vmatpush3.msra.mxu1 %v2895_v52 }
 0xe1b   :  { %4371 = vmatprep.subr.mxu1 %v4801_v19 }
 0xe1c   :  { %v5322_v27 = vpop.eup %4619 }
 0xe1d   :  { %v2799_v29 = vsel %vm257_vm2, %v5322_v27, 0.0  ;;  %v4622_v43 = vpop.eup %4621 }
 0xe1e   :  { %v2781_v18 = vsel %vm257_vm2, %v4622_v43, 0.0  ;;  %v4624_v45 = vpop.eup %4623 }
 0xe1f   :  { %v2790_v15 = vsel %vm257_vm2, %v4624_v45, 0.0 }
 0xe2d   :  { %2779 = vadd.xlane.f32.xlu0 %v2778_v9 }
 0xe31   :  { %2788 = vadd.xlane.f32.xlu0 %v2787_v54 }
 0xe35   :  { %2785 = vadd.xlane.f32.xlu0 %v2784_v3 }
 0xe39   :  { %2794 = vadd.xlane.f32.xlu0 %v2793_v6 }
 0xe3d   :  { %2800 = vadd.xlane.f32.xlu0 %v2799_v29 }
 0xe3e   :  { %v2750_v30 = vpop.xlane.xlu1 %2749 }
 0xe3f   :  { %v2760_v41 = vsub.f32 %v5291_v32, %v2750_v30 }
 0xe41   :  { %v2774_v42 = vmul.f32 1.442695, %v2760_v41 }
 0xe42   :  { %v2117_v33 = vpop.permute.xlu1 %2116 }
 0xe43   :  { %3198 = vrot.lane.b32.xlu1 %v2117_v33, %s4807_s6  ;;  %4625 = vpow2.f32 %v2774_v42 }
 0xe46   :  { %v2121_v34 = vpop.permute.xlu1 %2120 }
 0xe4a   :  { %v2819_v36 = vpop.permute.xlu1 %2818 }
 0xe4b   :  { %4357 = vmatpush3.msra.mxu0 %v2819_v36 }
 0xe4c   :  { %4366 = vmatprep.subr.mxu0 %v4801_v19 }
 0xe4d   :  { %v4626_v44 = vpop.eup %4625 }
 0xe4e   :  { %v2796_v21 = vsel %vm257_vm2, %v4626_v44, 0.0 }
 0xe53   :  { %3274 = vrot.lane.b32.xlu0 %v2119_v51, %s4807_s6 }
 0xe57   :  { %4552 = vrot.lane.b32.xlu0 %v4551_v59, %s4800_s4 }
 0xe67   :  { %2782 = vadd.xlane.f32.xlu1 %v2781_v18 }
 0xe6b   :  { %2791 = vadd.xlane.f32.xlu1 %v2790_v15 }
 0xe6f   :  { %2797 = vadd.xlane.f32.xlu1 %v2796_v21 }
 0xe7c   :  { %v2971_v48 = vpop.permute.xlu1 %2970 }
 0xe80   :  { %3350 = vrot.lane.b32.xlu1 %v2121_v34, %s4807_s6  ;;  %v3123_v55 = vpop.permute.xlu0 %3122 }
 0xe84   :  { %4557 = vrot.lane.b32.xlu1 %v4556_v63, %s4800_s4  ;;  %v3047_v61 = vpop.permute.xlu1 %3046 }
 0xeb5   :  { %v3199_v63 = vpop.permute.xlu1 %3198 }
 0xeba   :  { %v2780_v56 = vpop.xlane.xlu0 %2779 }
 0xebb   :  { %4627 = vrcp.f32 %v2780_v56 }
 0xebe   :  { %v2789_v59 = vpop.xlane.xlu0 %2788 }
 0xec2   :  { %v2786_v32 = vpop.xlane.xlu0 %2785 }
 0xec3   :  { %4629 = vrcp.f32 %v2786_v32 }
 0xec5   :  { %v4628_v46 = vpop.eup %4627 }
 0xec6   :  { %v2803_v47 = vmul.f32 %v4628_v46, %v4612_v24  ;;  %v2795_v16 = vpop.xlane.xlu0 %2794 }
 0xec8   :  { %4359 = vmatmul.mubr.msk.f32.vlgmr.msra.gmra.mrb[28].mxu0 %vm257_vm2, %v2803_v47 }
 0xec9   :  { %4367 = vmatpush3.msra.mxu0 %v2971_v48  ;;  %4368 = vmatprep.mubr.msk.f32.mxu0 %vm4803_vm1, %v4801_v19 }
 0xeca   :  { %4376 = vmatprep.subr.mxu0 %v4801_v19  ;;  %v2801_v51 = vpop.xlane.xlu0 %2800 }
 0xecd   :  { %v4630_v49 = vpop.eup %4629 }
 0xece   :  { %v2807_v60 = vmul.f32 %v4630_v49, %v4616_v22  ;;  %v3275_v17 = vpop.permute.xlu0 %3274 }
 0xed0   :  { %4369 = vmatmul.mubr.msk.f32.vlgmr.msra.gmra.mrb[30].mxu0 %vm257_vm2, %v2807_v60 }
 0xed1   :  { %4377 = vmatpush3.msra.mxu0 %v3123_v55  ;;  %4378 = vmatprep.mubr.msk.f32.mxu0 %vm4803_vm1, %v4801_v19 }
 0xed2   :  { %4386 = vmatprep.subr.mxu0 %v4801_v19  ;;  %v4553_v22 = vpop.permute.xlu0 %4552 }
 0xed3   :  { %v4555_v3 = vunpack.i.h.bf16 %v4553_v22 }
 0xef4   :  { %v2783_v50 = vpop.xlane.xlu1 %2782 }
 0xef5   :  { %4631 = vrcp.f32 %v2783_v50 }
 0xef6   :  { %4633 = vrcp.f32 %v2789_v59 }
 0xef8   :  { %v2792_v13 = vpop.xlane.xlu1 %2791 }
 0xef9   :  { %4635 = vrcp.f32 %v2792_v13 }
 0xefa   :  { %4637 = vrcp.f32 %v2795_v16 }
 0xefc   :  { %v2798_v12 = vpop.xlane.xlu1 %2797 }
 0xefd   :  { %4639 = vrcp.f32 %v2798_v12 }
 0xefe   :  { %4641 = vrcp.f32 %v2801_v51  ;;  %v3459_v51 = vrot.slane %v5187_v58, %v1730_v7 }
 0xeff   :  { %v4632_v52 = vpop.eup %4631 }
 0xf00   :  { %v2805_v53 = vmul.f32 %v4632_v52, %v4622_v43  ;;  %v4634_v57 = vpop.eup %4633 }
 0xf01   :  { %v2809_v5 = vmul.f32 %v4634_v57, %v5313_v25  ;;  %v3351_v25 = vpop.permute.xlu1 %3350 }
 0xf02   :  { %4364 = vmatmul.mubr.msk.f32.vlgmr.msra.gmra.mrb[30].mxu1 %vm257_vm2, %v2805_v53 }
 0xf03   :  { %v4636_v0 = vpop.eup %4635  ;;  %4372 = vmatpush3.msra.mxu1 %v3047_v61  ;;  %4373 = vmatprep.mubr.msk.f32.mxu1 %vm4803_vm1, %v4801_v19 }
 0xf04   :  { %v2811_v10 = vmul.f32 %v4636_v0, %v4624_v45  ;;  %4381 = vmatprep.subr.mxu1 %v4801_v19  ;;  %v4638_v14 = vpop.eup %4637 }
 0xf05   :  { %v2813_v24 = vmul.f32 %v4638_v14, %v5318_v4  ;;  %v4554_v4 = vunpack.i.l.bf16 %v4553_v22  ;;  %v4558_v29 = vpop.permute.xlu1 %4557 }
 0xf06   :  { %4374 = vmatmul.mubr.msk.f32.vlgmr.msra.gmra.mrb[32].mxu1 %vm257_vm2, %v2809_v5  ;;  %4379 = vmatmul.mubr.msk.f32.vlgmr.msra.gmra.mrb[32].mxu0 %vm257_vm2, %v2811_v10  ;;  %v4560_v30 = vunpack.i.h.bf16 %v4558_v29  ;;  %v4559_v33 = vunpack.i.l.bf16 %v4558_v29  ;;  %v1968_v29 = vld [vmem:[#allocation7 + $0x68] sm:$0xff] }
 0xf07   :  { %v4640_v20 = vpop.eup %4639  ;;  %4382 = vmatpush3.msra.mxu1 %v3199_v63  ;;  %4387 = vmatpush3.msra.mxu0 %v3275_v17  ;;  %v4480_v6 = vpack.c.bf16 %v4555_v3, %v4554_v4  ;;  %v1966_v3 = vld [vmem:[#allocation7 + $0x58] sm:$0xff] }
 0xf08   :  { %v2815_v62 = vmul.f32 %v4640_v20, %v4626_v44  ;;  %4383 = vmatprep.mubr.msk.f32.mxu1 %vm4803_vm1, %v4801_v19  ;;  %4388 = vmatprep.mubr.msk.f32.mxu0 %vm4803_vm1, %v4801_v19  ;;  %v4642_v9 = vpop.eup %4641  ;;  %v4484_v34 = vpack.c.bf16 %v4560_v30, %v4559_v33  ;;  %v1970_v30 = vld [vmem:[#allocation7 + $0x78] sm:$0xff] }
 0xf09   :  { %4391 = vmatprep.subr.mxu1 %v4801_v19  ;;  %v2817_v54 = vmul.f32 %v4642_v9, %v5322_v27  ;;  %4481 = vmatprep.subr.bf16.mxu0 %v4480_v6  ;;  %v4566_v33 = vpack.i.bf16 %v1970_v30, %v1968_v29 }
 0xf0a   :  { %4384 = vmatmul.mubr.msk.f32.vlgmr.msra.gmra.mrb[34].mxu1 %vm257_vm2, %v2813_v24  ;;  %4389 = vmatmul.mubr.msk.f32.vlgmr.msra.gmra.mrb[34].mxu0 %vm257_vm2, %v2815_v62 }
 0xf0b   :  { %4392 = vmatpush3.msra.mxu1 %v3351_v25  ;;  %4393 = vmatprep.mubr.msk.f32.mxu1 %vm4803_vm1, %v4801_v19 }
 0xf0c   :  { %4483 = vmatpush3.bf16.msra.mxu0 %v4480_v6 }
 0xf0d   :  { %4485 = vmatprep.subr.bf16.mxu0 %v4484_v34 }
 0xf0e   :  { %4394 = vmatmul.mubr.msk.f32.vlgmr.msra.gmra.mrb[36].mxu1 %vm257_vm2, %v2817_v54 }
 0xf10   :  { %4487 = vmatpush3.bf16.msra.mxu0 %v4484_v34  ;;  %v4492_v34 = vpack.c.bf16 %v1970_v30, %v1968_v29 }
 0xf9b   :  { %v2890_v36 = vpop.f32.mrb[28].mxu0 }
 0xf9c   :  { %v4360_v38 = vpop.f32.mrb[29].mxu0 }
 0xfa3   :  { %v3042_v39 = vpop.f32.mrb[30].mxu0 }
 0xfa4   :  { %3428 = vrot.lane.b32.xlu0 %v3042_v39, %s4795_s17  ;;  %v4370_v19 = vpop.f32.mrb[31].mxu0 }
 0xfd5   :  { %v2966_v27 = vpop.f32.mrb[30].mxu1 }
 0xfd6   :  { %v4365_v40 = vpop.f32.mrb[31].mxu1 }
 0xfd9   :  { %v3118_v41 = vpop.f32.mrb[32].mxu1  ;;  %v3194_v42 = vpop.f32.mrb[32].mxu0 }
 0xfda   :  { %3430 = vrot.lane.b32.xlu1 %v3118_v41, %s4795_s17  ;;  %v4375_v43 = vpop.f32.mrb[33].mxu1  ;;  %3436 = vrot.lane.b32.xlu0 %v3194_v42, %s4798_s8  ;;  %v4380_v18 = vpop.f32.mrb[33].mxu0  ;;  %s4809_s17 = smov [#allocation11]  }
 0xfdb   :  { %s3985_s9 = sshll.u32 %s4809_s17, 4  ;;  %s3986_s9 = int_to_ptr.vmem [resolvable:$true] %s3985_s9 }
 0xfdc   :  { %s4761_s10 = scalar_lea.vmem %s3986_s9, 64  ;;  %p4766_p13 = scmp.lt.s32.totalorder %s3986_s9, %s3986_s9 }
 0xfdd   :  { %v3270_v45 = vpop.f32.mrb[34].mxu1  ;;  %v3346_v15 = vpop.f32.mrb[34].mxu0  ;;  %p4762_p12 = scmp.ne.s32.totalorder %s3986_s9, %s4761_s10  ;;  %p4767_p0 = scmp.lt.s32.totalorder %s4761_s10, %s4761_s10 }
 0xfde   :  { %3438 = vrot.lane.b32.xlu1 %v3270_v45, %s4798_s8  ;;  %v4385_v44 = vpop.f32.mrb[35].mxu1  ;;  %3444 = vrot.lane.b32.xlu0 %v3346_v15, %s4808_s7  ;;  %v4390_v21 = vpop.f32.mrb[35].mxu0 }
 0xfdf   :  { %p4768_p1 = por %p4767_p0, %p4766_p13 }
 0xfe1   :  { %v3422_v55 = vpop.f32.mrb[36].mxu1  ;;  %p4769_p2 = pnand %p4768_p1, %p4762_p12 }
 0xfe2   :  { %3446 = vrot.lane.b32.xlu1 %v3422_v55, %s4808_s7  ;;  %v4395_v56 = vpop.f32.mrb[37].mxu1  ;;  %v3588_v55 = vrot.slane %v5187_v58, %v1736_v28  ;;  %v5403_v28 = vld [vmem:[#allocation10 + $0x10] sm:$0x1f] }
0x1016   :  { %v3429_v59 = vpop.permute.xlu0 %3428 }
0x1017   :  { %v3450_v47 = vsel %vm257_vm2, %v2890_v36, %v3429_v59  ;;  %v3594_v59 = vrot.slane %v5187_v58, %v1823_v37 }
0x104c   :  { %v3431_v32 = vpop.permute.xlu1 %3430  ;;  %v3437_v46 = vpop.permute.xlu0 %3436 }
0x104d   :  { %v3452_v48 = vsel %vm1586_vm3, %v3450_v47, %v3437_v46  ;;  %v3451_v63 = vsel %vm257_vm2, %v2966_v27, %v3431_v32 }
0x1050   :  { %v3439_v49 = vpop.permute.xlu1 %3438  ;;  %v3445_v60 = vpop.permute.xlu0 %3444 }
0x1051   :  { %v3454_v61 = vsel %vm1589_vm4, %v3452_v48, %v3445_v60  ;;  %v3453_v50 = vsel %vm1586_vm3, %v3451_v63, %v3439_v49  ;;  %v3600_v63 = vrot.slane %v5403_v28, %v4955_v23 }
0x1052   :  { %4404 = vmatprep.mubr.msk.f32.mxu0 %vm103_vm0, %v3454_v61 }
0x1054   :  { %v3447_v16 = vpop.permute.xlu1 %3446 }
0x1055   :  { %v3455_v13 = vsel %vm1589_vm4, %v3453_v50, %v3447_v16 }
0x1056   :  { %4405 = vmatmul.mubr.msk.f32.vlgmr.msra.gmra.mrb[36].mxu0 %vm103_vm0, %v3455_v13 }
0x1129   :  { %v4406_v12 = vpop.f32.mrb[36].mxu0 }
0x112a   :  { %v3554_v52 = vadd.f32 %v4406_v12, %v3459_v51  ;;  %v3548_v53 = vpop.f32.mrb[37].mxu0 }
0x112b   :  { %v3549_v57 = vadd.f32 %v3548_v53, %v3459_v51  ;;  %v3687_v51 = vrot.slane %v5403_v28, %v4913_v2 }
0x112c   :  { %v3558_v0 = vadd.f32 %v3554_v52, %v5199_v26 }
0x112d   :  { %v3557_v5 = vadd.f32 %v3549_v57, %v5197_v11  ;;  %v1964_v11 = vld [vmem:[#allocation7 + $0x48] sm:$0xff] }
0x112e   :  { %v3562_v10 = vsel %vm103_vm0, %v3558_v0, 0.0  ;;  %v4488_v4 = vpack.c.bf16 %v1966_v3, %v1964_v11  ;;  %v4561_v6 = vpack.i.bf16 %v1966_v3, %v1964_v11  ;;  %v3827_v3 = vld [vmem:[#allocation8 + $0x10] sm:$0xff] }
0x112f   :  { %3563 = vadd.xlane.f32.xlu1 %v3562_v10  ;;  %v3559_v14 = vsel %vm103_vm0, %v3557_v5, 0.0 }
0x1130   :  { %3560 = vadd.xlane.f32.xlu0 %v3559_v14  ;;  %4489 = vmatprep.subr.bf16.mxu1 %v4488_v4 }
0x1131   :  { %4491 = vmatpush3.bf16.msra.mxu1 %v4488_v4  ;;  %v3828_v4 = vld [vmem:[#allocation8 + $0x18] sm:$0xff] }
0x1132   :  { %4493 = vmatprep.subr.bf16.mxu1 %v4492_v34 }
0x1135   :  { %4495 = vmatpush3.bf16.msra.mxu1 %v4492_v34 }
0x1140   :  { %4562 = vrot.lane.b32.xlu1 %v4561_v6, %s4806_s30  ;;  %v4508_v6 = vpack.c.bf16 %v3828_v4, %v3827_v3 }
0x11bc   :  { %v3564_v17 = vpop.xlane.xlu1 %3563 }
0x11bd   :  { %v3566_v20 = vmul.f32 0.03125, %v3564_v17  ;;  %v3561_v24 = vpop.xlane.xlu0 %3560 }
0x11be   :  { %v3565_v62 = vmul.f32 0.03125, %v3561_v24 }
0x11bf   :  { %v3568_v9 = vsub.f32 %v3558_v0, %v3566_v20 }
0x11c0   :  { %v3567_v7 = vsub.f32 %v3557_v5, %v3565_v62  ;;  %v4563_v41 = vpop.permute.xlu1 %4562 }
0x11c1   :  { %v3570_v22 = vmul.f32 %v3568_v9, %v3568_v9  ;;  %v4565_v42 = vunpack.i.h.bf16 %v4563_v41  ;;  %v4564_v43 = vunpack.i.l.bf16 %v4563_v41 }
0x11c2   :  { %v3569_v25 = vmul.f32 %v3567_v7, %v3567_v7 }
0x11c3   :  { %v3574_v26 = vsel %vm103_vm0, %v3570_v22, 0.0  ;;  %v4496_v44 = vpack.c.bf16 %v4565_v42, %v4564_v43  ;;  %v3825_v22 = vld [vmem:[#allocation8] sm:$0xff]  ;;  %v3822_v42 = vrot.slane %v5403_v28, %v5131_v31 }
0x11c4   :  { %v3571_v54 = vsel %vm103_vm0, %v3569_v25, 0.0 }
0x11c5   :  { %3572 = vadd.xlane.f32.xlu0 %v3571_v54  ;;  %4497 = vmatprep.subr.bf16.mxu0 %v4496_v44 }
0x11c6   :  { %4499 = vmatpush3.bf16.msra.mxu0 %v4496_v44  ;;  %v3832_v44 = vrot.slane %v5403_v28, %v5144_v8 }
0x11c9   :  { %3575 = vadd.xlane.f32.xlu0 %v3574_v26  ;;  %v3826_v26 = vld [vmem:[#allocation8 + $0x8] sm:$0xff] }
0x11ca   :  { %v4504_v11 = vpack.c.bf16 %v3826_v26, %v3825_v22 }
0x11cc   :  { %4505 = vmatprep.subr.bf16.mxu1 %v4504_v11 }
0x11df   :  { %4567 = vrot.lane.b32.xlu0 %v4566_v33, %s4806_s30 }
0x1252   :  { %v3573_v36 = vpop.xlane.xlu0 %3572 }
0x1253   :  { %v3577_v38 = vmul.f32 0.03125, %v3573_v36 }
0x1255   :  { %v3579_v39 = vadd.f32 1e-05, %v3577_v38 }
0x1256   :  { %v3576_v19 = vpop.xlane.xlu0 %3575 }
0x1257   :  { %4643 = vrsqrt.f32 %v3579_v39  ;;  %v3578_v27 = vmul.f32 0.03125, %v3576_v19  ;;  %v3816_v39 = vrot.slane %v5403_v28, %v4980_v35 }
0x1259   :  { %v3580_v40 = vadd.f32 1e-05, %v3578_v27 }
0x125a   :  { %v4568_v18 = vpop.permute.xlu0 %4567 }
0x125b   :  { %4645 = vrsqrt.f32 %v3580_v40  ;;  %v4570_v45 = vunpack.i.h.bf16 %v4568_v18  ;;  %v4569_v15 = vunpack.i.l.bf16 %v4568_v18 }
0x125d   :  { %v4500_v21 = vpack.c.bf16 %v4570_v45, %v4569_v15 }
0x125f   :  { %4501 = vmatprep.subr.bf16.mxu0 %v4500_v21 }
0x1260   :  { %4503 = vmatpush3.bf16.msra.mxu0 %v4500_v21 }
0x1261   :  { %v4644_v56 = vpop.eup %4643 }
0x1262   :  { %v3583_v32 = vmul.f32 %v4644_v56, %v3567_v7 }
0x1264   :  { %v3589_v46 = vmul.f32 %v3588_v55, %v3583_v32 }
0x1265   :  { %v4646_v47 = vpop.eup %4645 }
0x1266   :  { %v3584_v48 = vmul.f32 %v4646_v47, %v3568_v9  ;;  %v3595_v49 = vadd.f32 %v3594_v59, %v3589_v46 }
0x1268   :  { %4415 = vmatprep.mubr.msk.f32.mxu1 %vm103_vm0, %v3595_v49  ;;  %v3590_v60 = vmul.f32 %v3588_v55, %v3584_v48 }
0x126a   :  { %v3596_v61 = vadd.f32 %v3594_v59, %v3590_v60 }
0x126c   :  { %4416 = vmatmul.mubr.msk.f32.vlgmr.msra.gmra.mrb[38].mxu1 %vm103_vm0, %v3596_v61 }
0x126d   :  { %4507 = vmatpush3.bf16.msra.mxu1 %v4504_v11 }
0x126e   :  { %4509 = vmatprep.subr.bf16.mxu1 %v4508_v6 }
0x1271   :  { %4511 = vmatpush3.bf16.msra.mxu1 %v4508_v6 }
0x133f   :  { %v4417_v1 = vpop.f32.mrb[38].mxu1 }
0x1340   :  { %v3679_v50 = vadd.f32 %v4417_v1, %v3600_v63  ;;  %v3673_v37 = vpop.f32.mrb[39].mxu1 }
0x1341   :  { %v3674_v58 = vadd.f32 %v3673_v37, %v3600_v63 }
0x1342   :  { %v3683_v13 = vmax.f32 %v3679_v50, 0.0 }
0x1343   :  { %v3682_v16 = vmax.f32 %v3674_v58, 0.0 }
0x1345   :  { %4426 = vmatprep.mubr.msk.f32.mxu0 %vm103_vm0, %v3682_v16 }
0x1346   :  { %4427 = vmatmul.mubr.msk.f32.vlgmr.msra.gmra.mrb[38].mxu0 %vm103_vm0, %v3683_v13 }
0x1419   :  { %v4428_v12 = vpop.f32.mrb[38].mxu0 }
0x141a   :  { %v3782_v52 = vadd.f32 %v4428_v12, %v3687_v51  ;;  %v3776_v53 = vpop.f32.mrb[39].mxu0 }
0x141b   :  { %v3777_v57 = vadd.f32 %v3776_v53, %v3687_v51 }
0x141c   :  { %v3786_v0 = vadd.f32 %v3782_v52, %v3596_v61 }
0x141d   :  { %v3785_v5 = vadd.f32 %v3777_v57, %v3595_v49 }
0x141e   :  { %v3790_v23 = vsel %vm103_vm0, %v3786_v0, 0.0 }
0x141f   :  { %3791 = vadd.xlane.f32.xlu0 %v3790_v23  ;;  %v3787_v10 = vsel %vm103_vm0, %v3785_v5, 0.0 }
0x1420   :  { %3788 = vadd.xlane.f32.xlu1 %v3787_v10 }
0x14ac   :  { %v3792_v14 = vpop.xlane.xlu0 %3791 }
0x14ad   :  { %v3794_v17 = vmul.f32 0.03125, %v3792_v14  ;;  %v3789_v20 = vpop.xlane.xlu1 %3788 }
0x14ae   :  { %v3793_v24 = vmul.f32 0.03125, %v3789_v20 }
0x14af   :  { %v3796_v62 = vsub.f32 %v3786_v0, %v3794_v17 }
0x14b0   :  { %v3795_v9 = vsub.f32 %v3785_v5, %v3793_v24 }
0x14b1   :  { %v3798_v7 = vmul.f32 %v3796_v62, %v3796_v62 }
0x14b2   :  { %v3797_v2 = vmul.f32 %v3795_v9, %v3795_v9 }
0x14b3   :  { %v3802_v25 = vsel %vm103_vm0, %v3798_v7, 0.0 }
0x14b4   :  { %3803 = vadd.xlane.f32.xlu0 %v3802_v25  ;;  %v3799_v54 = vsel %vm103_vm0, %v3797_v2, 0.0 }
0x14b5   :  { %3800 = vadd.xlane.f32.xlu1 %v3799_v54 }
0x1541   :  { %v3804_v29 = vpop.xlane.xlu0 %3803 }
0x1542   :  { %v3806_v30 = vmul.f32 0.03125, %v3804_v29  ;;  %v3801_v33 = vpop.xlane.xlu1 %3800 }
0x1543   :  { %v3805_v34 = vmul.f32 0.03125, %v3801_v33 }
0x1544   :  { %v3808_v36 = vadd.f32 1e-05, %v3806_v30 }
0x1545   :  { %v3807_v38 = vadd.f32 1e-05, %v3805_v34 }
0x1546   :  { %4647 = vrsqrt.f32 %v3808_v36 }
0x1547   :  { %4649 = vrsqrt.f32 %v3807_v38 }
0x1550   :  { %v4648_v19 = vpop.eup %4647 }
0x1551   :  { %v4650_v27 = vpop.eup %4649  ;;  %v3812_v40 = vmul.f32 %v4648_v19, %v3796_v62 }
0x1552   :  { %v3811_v41 = vmul.f32 %v4650_v27, %v3795_v9 }
0x1553   :  { %v3818_v43 = vmul.f32 %v3816_v39, %v3812_v40 }
0x1554   :  { %v3817_v18 = vmul.f32 %v3816_v39, %v3811_v41 }
0x1555   :  { %v3824_v15 = vadd.f32 %v3822_v42, %v3818_v43 }
0x1556   :  { %v3823_v45 = vadd.f32 %v3822_v42, %v3817_v18 }
0x1558   :  { %4437 = vmatprep.mubr.msk.f32.mxu1 %vm103_vm0, %v3823_v45 }
0x1559   :  { %4438 = vmatmul.mubr.msk.f32.vlgmr.msra.gmra.mrb[40].mxu1 %vm103_vm0, %v3824_v15 }
0x162c   :  { %v4439_v21 = vpop.f32.mrb[40].mxu1 }
0x162d   :  { %v3911_v35 = vadd.f32 %v4439_v21, %v3832_v44  ;;  %v3905_v55 = vpop.f32.mrb[41].mxu1 }
0x162e   :  { %v3906_v56 = vadd.f32 %v3905_v55, %v3832_v44 }
0x162f   :  { %v3942_v59 = vrot.slane %v3911_v35, 4  ;;  %v3932_v32 = vrot.slane %v3911_v35, 2  ;;  %v3926_v46 = vrot.slane %v3911_v35, 1  ;;  %v3948_v31 = vrot.slane %v3911_v35, 5 }
0x1630   :  { %v3941_v47 = vrot.slane %v3906_v56, 5  ;;  %v3920_v48 = vrot.slane %v3906_v56, 1  ;;  %v3931_v49 = vrot.slane %v3906_v56, 3  ;;  %v3925_v60 = vrot.slane %v3906_v56, 2 }
0x1631   :  { %v3947_v61 = vrot.slane %v3906_v56, 6  ;;  %v3953_v63 = vrot.slane %v3906_v56, 7  ;;  %v3954_v1 = vrot.slane %v3911_v35, 6  ;;  %v3938_v50 = vrot.slane %v3911_v35, 3 }
0x1632   :  { %v3943_v37 = vsel %vm3917_vm5, %v3942_v59, %v3941_v47  ;;  %v3921_v8 = vsel %vm3917_vm5, %v3911_v35, %v3920_v48  ;;  %v3933_v28 = vsel %vm3917_vm5, %v3932_v32, %v3931_v49  ;;  %v3927_v58 = vsel %vm3917_vm5, %v3926_v46, %v3925_v60 }
0x1633   :  { %3944 = vrot.lane.b32.xlu0 %v3943_v37, %s4800_s4  ;;  %3922 = vrot.lane.b32.xlu1 %v3921_v8, %s4800_s4  ;;  %v3949_v16 = vsel %vm3917_vm5, %v3948_v31, %v3947_v61  ;;  %v3955_v13 = vsel %vm3917_vm5, %v3954_v1, %v3953_v63  ;;  %v3937_v51 = vrot.slane %v3906_v56, 4  ;;  %v3916_v12 = vrot.slane %v3911_v35, 7 }
0x1635   :  { %v3939_v52 = vsel %vm3917_vm5, %v3938_v50, %v3937_v51  ;;  %v3918_v53 = vsel %vm3917_vm5, %v3916_v12, %v3906_v56 }
0x1637   :  { %3934 = vrot.lane.b32.xlu0 %v3933_v28, %s4806_s30  ;;  %3928 = vrot.lane.b32.xlu1 %v3927_v58, %s4807_s6 }
0x163b   :  { %3950 = vrot.lane.b32.xlu1 %v3949_v16, %s4807_s6 }
0x163f   :  { %3956 = vrot.lane.b32.xlu1 %v3955_v13, %s4806_s30 }
0x16a5   :  { %v3923_v57 = vpop.permute.xlu1 %3922  ;;  %v3945_v0 = vpop.permute.xlu0 %3944 }
0x16a6   :  { %v3959_v10 = vsel %vm103_vm0, %v3918_v53, %v3923_v57  ;;  %v3964_v20 = vsel %vm103_vm0, %v3939_v52, %v3945_v0 }
0x16a9   :  { %v3929_v5 = vpop.permute.xlu1 %3928  ;;  %v3935_v14 = vpop.permute.xlu0 %3934 }
0x16aa   :  { %v3961_v17 = vsel %vm3960_vm6, %v3959_v10, %v3929_v5 }
0x16ab   :  { %v3963_v9 = vsel %vm3962_vm7, %v3961_v17, %v3935_v14 }
0x16ad   :  { %v3951_v23 = vpop.permute.xlu1 %3950 }
0x16ae   :  { %v3965_v24 = vsel %vm3960_vm6, %v3964_v20, %v3951_v23 }
0x16b1   :  { %v3957_v62 = vpop.permute.xlu1 %3956 }
0x16b2   :  { %v3966_v7 = vsel %vm3962_vm7, %v3965_v24, %v3957_v62 }
0x16b3   :  { %v3969_v2 = vcombine.low %v3963_v9, %v3966_v7 }
0x16b5   :  { %4062 = vst.sshfl [vmem:[#allocation11] sm:$0x33 pattern:$0x76325410] %v3969_v2 }
0x16b6   :  { %4772 = shalt.err (!%p4769_p2)
}
0x16b7   :  { %s4773_s13 = scalar_lea.hbm %s5456_s5, 64 }
0x16b8   :  { %p4774_p3 = scmp.ne.s32.totalorder %s5456_s5, %s4773_s13  ;;  %p4777_p4 = scmp.lt.u32.totalorder %s4773_s13, %s5456_s5 }
0x16ba   :  { %p4779_p5 = pnand %p4777_p4, %p4774_p3 }
0x16bc   :  { %4782 = shalt.err (!%p4779_p5)
}
0x16bd   :  { %3988 = dma.vmem_to_hbm [thread:$0]  %s3986_s9, 64, %s5456_s5, [#allocation4]  }
0x16be   :  { %4789 = dma.done.wait [#allocation4], 64  }
0x16bf   :  { %4790 = vsyncadd [#allocation4], 4294967232 }
0x16c0   :  { %3992 = vsyncpa [#allocation3], 1 }
0x16c1   :  { %3993 = vsyncpa [#allocation6], 1 }
0x16c2   :  { %3994 = vsyncpa [#allocation9], 1 }
0x16c3   :  { %3995 = vsyncpa [#allocation4], 1 }

</bundles_post_ra>
